<compile_context>
chip_gen: v7x
topology: tpu7x:2x2x1
jax: 0.10.0
libtpu: 0.0.40
codegen_flags: <defaults>
</compile_context>

<pallas_src>
import functools

import jax
import jax.numpy as jnp
from jax.experimental import pallas as pl
from jax.experimental.pallas import tpu as pltpu


def _pick_out_tile(out_flat, max_tile=8192):
    """Largest multiple-of-128 divisor of out_flat not exceeding max_tile."""
    if out_flat <= max_tile:
        return out_flat
    start = max_tile - (max_tile % 128)
    for t in range(start, 127, -128):
        if out_flat % t == 0:
            return t
    return out_flat


# ---------------------------------------------------------------------------
# Single fused kernel: conv3x3(s2,p1) + ReLU + encoder linear + LSTM
# (last hidden) + decoder linear.  Grid tiles only the decoder output dim;
# the encoder/LSTM run once on grid step 0 with the result cached in VMEM.
# ---------------------------------------------------------------------------
def _spatial_temporal_kernel(patch_ref,   # (CK, N*P)  im2col, frames on lanes
                             wconv_ref,   # (Cout, CK)
                             bconv_ref,   # (Cout, 1)
                             wenc_ref,    # (Cout, P, F)
                             benc_ref,    # (1, F)
                             wih_ref,     # (F, 4H)   gates [i, f, g, o]
                             whh_ref,     # (Hd, 4H)
                             bcat_ref,    # (1, 4H)   b_ih + b_hh pre-summed
                             wdec_ref,    # (Hd, TILE_OUT)
                             bdec_ref,    # (1, TILE_OUT)
                             o_ref,       # (B, TILE_OUT)
                             h_ref,       # scratch (B, Hd)
                             *, n_frames, batch, seq_len, patch_px, hidden):
    N, P, B, S, Hd = n_frames, patch_px, batch, seq_len, hidden
    Cout = wconv_ref.shape[0]
    F = benc_ref.shape[-1]

    # Encoder + LSTM run once; later decoder tiles reuse h_ref from scratch.
    @pl.when(pl.program_id(0) == 0)
    def _encode_and_recur():
        # --- CNN encoder: conv as ONE lane-dense matmul + bias + ReLU ------
        conv = jnp.dot(wconv_ref[...], patch_ref[...],
                       preferred_element_type=jnp.float32)       # (Cout, N*P)
        conv = jnp.maximum(conv + bconv_ref[...], 0.0)

        # --- encoder linear, batched over frames ---------------------------
        # feat[n, f] = b_enc[f] + sum_{c,p} conv[c, n*P + p] * w_enc[c, p, f]
        # The frame de-interleave uses static lane slices + sublane concat
        # (all guaranteed-supported ops; no minor-dim reshape).
        blocks = [conv[:, n * P:(n + 1) * P] for n in range(N)]  # N x (Cout,P)
        acc = jnp.zeros((N, F), jnp.float32)
        for c in range(Cout):
            slab = jnp.concatenate(
                [blocks[n][c:c + 1, :] for n in range(N)], axis=0)  # (N, P)
            acc = acc + jnp.dot(slab, wenc_ref[c],
                                preferred_element_type=jnp.float32)
        feat = acc + benc_ref[...]                                 # (N, F)

        # --- LSTM: hoisted input projection, concatenated gate weights -----
        xw = jnp.dot(feat, wih_ref[...],
                     preferred_element_type=jnp.float32) + bcat_ref[...]  # (N, 4H)
        h = jnp.zeros((B, Hd), jnp.float32)
        c_state = jnp.zeros((B, Hd), jnp.float32)
        for t in range(S):                      # S is small & static
            gates = xw[t * B:(t + 1) * B, :] + jnp.dot(
                h, whh_ref[...], preferred_element_type=jnp.float32)  # (B, 4H)
            i_g = jax.nn.sigmoid(gates[:, 0 * Hd:1 * Hd])
            f_g = jax.nn.sigmoid(gates[:, 1 * Hd:2 * Hd])
            g_g = jnp.tanh(gates[:, 2 * Hd:3 * Hd])
            o_g = jax.nn.sigmoid(gates[:, 3 * Hd:4 * Hd])
            c_state = f_g * c_state + i_g * g_g
            h = o_g * jnp.tanh(c_state)
        h_ref[...] = h

    # --- decoder tile: the only HBM write, lane-dense ----------------------
    out = jnp.dot(h_ref[...], wdec_ref[...],
                  preferred_element_type=jnp.float32) + bdec_ref[...]
    o_ref[...] = out.astype(o_ref.dtype)


def spatial_temporal_forward(patches_t, w_conv, b_conv, w_enc, b_enc,
                             w_ih, w_hh, b_cat, w_dec, b_dec,
                             *, batch, seq_len, tile_out):
    """patches_t: (C*9, S*B*Ho*Wo) -> decoded output (B, out_flat)."""
    CK, NP = patches_t.shape
    Cout, P, F = w_enc.shape
    Hd = w_hh.shape[0]
    out_flat = w_dec.shape[-1]
    N = batch * seq_len
    assert NP == N * P
    n_tiles = out_flat // tile_out

    kernel = functools.partial(
        _spatial_temporal_kernel, n_frames=N, batch=batch, seq_len=seq_len,
        patch_px=P, hidden=Hd)

    return pl.pallas_call(
        kernel,
        out_shape=jax.ShapeDtypeStruct((batch, out_flat), jnp.float32),
        grid=(n_tiles,),
        in_specs=[
            pl.BlockSpec((CK, NP), lambda j: (0, 0)),
            pl.BlockSpec((Cout, CK), lambda j: (0, 0)),
            pl.BlockSpec((Cout, 1), lambda j: (0, 0)),
            pl.BlockSpec((Cout, P, F), lambda j: (0, 0, 0)),
            pl.BlockSpec((1, F), lambda j: (0, 0)),
            pl.BlockSpec((F, 4 * Hd), lambda j: (0, 0)),
            pl.BlockSpec((Hd, 4 * Hd), lambda j: (0, 0)),
            pl.BlockSpec((1, 4 * Hd), lambda j: (0, 0)),
            pl.BlockSpec((Hd, tile_out), lambda j: (0, j)),
            pl.BlockSpec((1, tile_out), lambda j: (0, j)),
        ],
        out_specs=pl.BlockSpec((batch, tile_out), lambda j: (0, j)),
        scratch_shapes=[pltpu.VMEM((batch, Hd), jnp.float32)],
        compiler_params=pltpu.CompilerParams(
            dimension_semantics=("arbitrary",),      # step 0 feeds all tiles
            vmem_limit_bytes=32 * 1024 * 1024),
    )(patches_t, w_conv, b_conv, w_enc, b_enc, w_ih, w_hh, b_cat, w_dec, b_dec)


# ---------------------------------------------------------------------------
# Model wrapper (parameter setup + free reshapes in plain JAX, hot path is the
# single fused Pallas kernel above).
# ---------------------------------------------------------------------------
class SpacialTemporalDecoderPallas:
    def __init__(self, key, *, in_channels=4, img_hw=16, conv_out=8,
                 feat_dim=32, hidden_dim=32):
        self.C = in_channels
        self.HW = img_hw
        self.conv_out = conv_out
        self.feat_dim = feat_dim
        self.hidden_dim = hidden_dim
        self.h_out = img_hw // 2                  # conv3x3 stride-2 pad-1
        P = self.h_out * self.h_out

        k = jax.random.split(key, 8)
        s = 0.1
        # Conv2d(C, conv_out, 3, stride=2, padding=1) weight in PyTorch layout
        # (C_out, C_in*kh*kw); matches conv_general_dilated_patches'
        # channel-major (C, kh, kw) feature ordering.
        self.w_conv = s * jax.random.normal(k[0], (conv_out, in_channels * 9),
                                            jnp.float32)
        self.b_conv = s * jax.random.normal(k[1], (conv_out, 1), jnp.float32)
        # Encoder linear stored as (C_out, Ho*Wo, feat): channel-first flatten
        # order, i.e. the PyTorch (feat, C_out*Ho*Wo) weight transposed.
        self.w_enc = s * jax.random.normal(k[2], (conv_out, P, feat_dim),
                                           jnp.float32)
        self.b_enc = s * jax.random.normal(k[3], (1, feat_dim), jnp.float32)
        # LSTM: concatenated gate weights [i|f|g|o] along the 4H axis
        # (PyTorch weight_ih_l0/weight_hh_l0 transposed); bias is the
        # pre-summed b_ih + b_hh.
        self.w_ih = s * jax.random.normal(k[4], (feat_dim, 4 * hidden_dim),
                                          jnp.float32)
        self.w_hh = s * jax.random.normal(k[5], (hidden_dim, 4 * hidden_dim),
                                          jnp.float32)
        self.b_lstm = s * jax.random.normal(k[6], (1, 4 * hidden_dim),
                                            jnp.float32)
        # Decoder: linear hidden -> C*H*W
        out_flat = in_channels * img_hw * img_hw
        self.w_dec = s * jax.random.normal(k[7], (hidden_dim, out_flat),
                                           jnp.float32)
        self.b_dec = jnp.zeros((1, out_flat), jnp.float32)
        self.tile_out = _pick_out_tile(out_flat)
        # TODO(synk): CNNEncoder/CNNDecoder/TemporalLSTM internals are not
        # given in the source repo; this uses an equivalent synthetic
        # conv+linear encoder, single-layer LSTM, and linear decoder.

    def __call__(self, x, batch_first=True):
        if batch_first:
            x = jnp.swapaxes(x, 0, 1)                 # (S, B, C, H, W)
        S, B = x.shape[0], x.shape[1]
        frames = x.reshape(S * B, self.C, self.HW, self.HW)
        # im2col matching Conv2d(k=3, stride=2, padding=1): (N, C*9, Ho, Wo).
        patches = jax.lax.conv_general_dilated_patches(
            frames, filter_shape=(3, 3), window_strides=(2, 2),
            padding=((1, 1), (1, 1)))
        N, CK, Ho, Wo = patches.shape
        # Fold frames onto the lane axis (layout plumbing done by XLA on a
        # tiny tensor) so the in-kernel conv is one lane-dense matmul.
        patches_t = (patches.reshape(N, CK, Ho * Wo)
                     .transpose(1, 0, 2)
                     .reshape(CK, N * Ho * Wo))
        out = spatial_temporal_forward(
            patches_t, self.w_conv, self.b_conv, self.w_enc, self.b_enc,
            self.w_ih, self.w_hh, self.b_lstm, self.w_dec, self.b_dec,
            batch=B, seq_len=S, tile_out=self.tile_out)   # (B, C*H*W)
        return out.reshape(B, self.C, self.HW, self.HW)


if __name__ == "__main__":
    key = jax.random.PRNGKey(0)
    k_param, k_x = jax.random.split(key)

    B, S, C, H, W = 2, 4, 4, 16, 16
    model = SpacialTemporalDecoderPallas(
        k_param, in_channels=C, img_hw=H, conv_out=8, feat_dim=32,
        hidden_dim=32)

    x = jax.random.normal(k_x, (B, S, C, H, W), jnp.float32)
    out = jax.block_until_ready(model(x, batch_first=True))
    assert out.shape == (B, C, H, W), out.shape
    assert bool(jnp.all(jnp.isfinite(out)))
    print("KERNEL_OK")
</pallas_src>

<mosaic_0001>
module attributes {stable_mosaic.version = 11 : i64} {
  func.func @_spatial_temporal_kernel(%arg0: i32, %arg1: memref<36x512xf32, #tpu.memory_space<vmem>>, %arg2: memref<8x36xf32, #tpu.memory_space<vmem>>, %arg3: memref<8x1xf32, #tpu.memory_space<vmem>>, %arg4: memref<8x64x32xf32, #tpu.memory_space<vmem>>, %arg5: memref<1x32xf32, #tpu.memory_space<vmem>>, %arg6: memref<32x128xf32, #tpu.memory_space<vmem>>, %arg7: memref<32x128xf32, #tpu.memory_space<vmem>>, %arg8: memref<1x128xf32, #tpu.memory_space<vmem>>, %arg9: memref<32x1024xf32, #tpu.memory_space<vmem>>, %arg10: memref<1x1024xf32, #tpu.memory_space<vmem>>, %arg11: memref<2x1024xf32, #tpu.memory_space<vmem>>, %arg12: memref<2x32xf32, #tpu.memory_space<vmem>>) attributes {dimension_semantics = [#tpu.dimension_semantics<arbitrary>], iteration_bounds = array<i64: 1>, scalar_prefetch = 0 : i64, scratch_operands = 1 : i64, tpu.core_type = #tpu.core_type<tc>, window_params = [{pipeline_mode = #tpu.pipeline_mode<synchronous>, transform_indices = @transform_0, window_bounds = array<i64: 36, 512>}, {pipeline_mode = #tpu.pipeline_mode<synchronous>, transform_indices = @transform_1, window_bounds = array<i64: 8, 36>}, {pipeline_mode = #tpu.pipeline_mode<synchronous>, transform_indices = @transform_2, window_bounds = array<i64: 8, 1>}, {pipeline_mode = #tpu.pipeline_mode<synchronous>, transform_indices = @transform_3, window_bounds = array<i64: 8, 64, 32>}, {pipeline_mode = #tpu.pipeline_mode<synchronous>, transform_indices = @transform_4, window_bounds = array<i64: 1, 32>}, {pipeline_mode = #tpu.pipeline_mode<synchronous>, transform_indices = @transform_5, window_bounds = array<i64: 32, 128>}, {pipeline_mode = #tpu.pipeline_mode<synchronous>, transform_indices = @transform_6, window_bounds = array<i64: 32, 128>}, {pipeline_mode = #tpu.pipeline_mode<synchronous>, transform_indices = @transform_7, window_bounds = array<i64: 1, 128>}, {transform_indices = @transform_8, window_bounds = array<i64: 32, 1024>}, {transform_indices = @transform_9, window_bounds = array<i64: 1, 1024>}, {transform_indices = @transform_10, window_bounds = array<i64: 2, 1024>}]} {
    %c0_i32 = arith.constant 0 : i32
    %0 = arith.cmpi eq, %arg0, %c0_i32 : i32
    %1 = arith.extui %0 : i1 to i32
    %c0_i32_0 = arith.constant 0 : i32
    %2 = arith.cmpi ne, %1, %c0_i32_0 : i32
    scf.if %2 {
      %c0_8 = arith.constant 0 : index
      %c0_9 = arith.constant 0 : index
      %10 = vector.load %arg2[%c0_8, %c0_9] : memref<8x36xf32, #tpu.memory_space<vmem>>, vector<8x36xf32>
      %c0_10 = arith.constant 0 : index
      %c0_11 = arith.constant 0 : index
      %11 = vector.load %arg1[%c0_10, %c0_11] : memref<36x512xf32, #tpu.memory_space<vmem>>, vector<36x512xf32>
      %cst_12 = arith.constant dense<0.000000e+00> : vector<8x512xf32>
      %12 = tpu.matmul %10, %11, %cst_12 {dimension_numbers = #tpu.dot_dimension_numbers<[1], [0], [0], [1], [0, 0, 1, 1], [], []>} : vector<8x36xf32>, vector<36x512xf32>, vector<8x512xf32> -> vector<8x512xf32>
      %c0_13 = arith.constant 0 : index
      %c0_14 = arith.constant 0 : index
      %13 = vector.load %arg3[%c0_13, %c0_14] : memref<8x1xf32, #tpu.memory_space<vmem>>, vector<8x1xf32>
      %14 = vector.broadcast %13 : vector<8x1xf32> to vector<8x512xf32>
      %15 = arith.addf %12, %14 : vector<8x512xf32>
      %cst_15 = arith.constant 0.000000e+00 : f32
      %16 = vector.broadcast %cst_15 : f32 to vector<8x512xf32>
      %17 = arith.maximumf %15, %16 : vector<8x512xf32>
      %18 = vector.extract_strided_slice %17 {offsets = [0, 0], sizes = [8, 64], strides = [1, 1]} : vector<8x512xf32> to vector<8x64xf32>
      %19 = vector.extract_strided_slice %17 {offsets = [0, 64], sizes = [8, 64], strides = [1, 1]} : vector<8x512xf32> to vector<8x64xf32>
      %20 = vector.extract_strided_slice %17 {offsets = [0, 128], sizes = [8, 64], strides = [1, 1]} : vector<8x512xf32> to vector<8x64xf32>
      %21 = vector.extract_strided_slice %17 {offsets = [0, 192], sizes = [8, 64], strides = [1, 1]} : vector<8x512xf32> to vector<8x64xf32>
      %22 = vector.extract_strided_slice %17 {offsets = [0, 256], sizes = [8, 64], strides = [1, 1]} : vector<8x512xf32> to vector<8x64xf32>
      %23 = vector.extract_strided_slice %17 {offsets = [0, 320], sizes = [8, 64], strides = [1, 1]} : vector<8x512xf32> to vector<8x64xf32>
      %24 = vector.extract_strided_slice %17 {offsets = [0, 384], sizes = [8, 64], strides = [1, 1]} : vector<8x512xf32> to vector<8x64xf32>
      %25 = vector.extract_strided_slice %17 {offsets = [0, 448], sizes = [8, 64], strides = [1, 1]} : vector<8x512xf32> to vector<8x64xf32>
      %cst_16 = arith.constant 0.000000e+00 : f32
      %26 = vector.broadcast %cst_16 : f32 to vector<8x32xf32>
      %27 = vector.extract_strided_slice %18 {offsets = [0, 0], sizes = [1, 64], strides = [1, 1]} : vector<8x64xf32> to vector<1x64xf32>
      %28 = vector.extract_strided_slice %19 {offsets = [0, 0], sizes = [1, 64], strides = [1, 1]} : vector<8x64xf32> to vector<1x64xf32>
      %29 = vector.extract_strided_slice %20 {offsets = [0, 0], sizes = [1, 64], strides = [1, 1]} : vector<8x64xf32> to vector<1x64xf32>
      %30 = vector.extract_strided_slice %21 {offsets = [0, 0], sizes = [1, 64], strides = [1, 1]} : vector<8x64xf32> to vector<1x64xf32>
      %31 = vector.extract_strided_slice %22 {offsets = [0, 0], sizes = [1, 64], strides = [1, 1]} : vector<8x64xf32> to vector<1x64xf32>
      %32 = vector.extract_strided_slice %23 {offsets = [0, 0], sizes = [1, 64], strides = [1, 1]} : vector<8x64xf32> to vector<1x64xf32>
      %33 = vector.extract_strided_slice %24 {offsets = [0, 0], sizes = [1, 64], strides = [1, 1]} : vector<8x64xf32> to vector<1x64xf32>
      %34 = vector.extract_strided_slice %25 {offsets = [0, 0], sizes = [1, 64], strides = [1, 1]} : vector<8x64xf32> to vector<1x64xf32>
      %35 = tpu.concatenate %27, %28, %29, %30, %31, %32, %33, %34 in 0 : vector<1x64xf32>, vector<1x64xf32>, vector<1x64xf32>, vector<1x64xf32>, vector<1x64xf32>, vector<1x64xf32>, vector<1x64xf32>, vector<1x64xf32> -> vector<8x64xf32>
      %c0_17 = arith.constant 0 : index
      %c0_18 = arith.constant 0 : index
      %c0_19 = arith.constant 0 : index
      %36 = vector.load %arg4[%c0_17, %c0_18, %c0_19] : memref<8x64x32xf32, #tpu.memory_space<vmem>>, vector<1x64x32xf32>
      %37 = vector.shape_cast %36 : vector<1x64x32xf32> to vector<64x32xf32>
      %cst_20 = arith.constant dense<0.000000e+00> : vector<8x32xf32>
      %38 = tpu.matmul %35, %37, %cst_20 {dimension_numbers = #tpu.dot_dimension_numbers<[1], [0], [0], [1], [0, 0, 1, 1], [], []>} : vector<8x64xf32>, vector<64x32xf32>, vector<8x32xf32> -> vector<8x32xf32>
      %39 = arith.addf %26, %38 : vector<8x32xf32>
      %40 = vector.extract_strided_slice %18 {offsets = [1, 0], sizes = [1, 64], strides = [1, 1]} : vector<8x64xf32> to vector<1x64xf32>
      %41 = vector.extract_strided_slice %19 {offsets = [1, 0], sizes = [1, 64], strides = [1, 1]} : vector<8x64xf32> to vector<1x64xf32>
      %42 = vector.extract_strided_slice %20 {offsets = [1, 0], sizes = [1, 64], strides = [1, 1]} : vector<8x64xf32> to vector<1x64xf32>
      %43 = vector.extract_strided_slice %21 {offsets = [1, 0], sizes = [1, 64], strides = [1, 1]} : vector<8x64xf32> to vector<1x64xf32>
      %44 = vector.extract_strided_slice %22 {offsets = [1, 0], sizes = [1, 64], strides = [1, 1]} : vector<8x64xf32> to vector<1x64xf32>
      %45 = vector.extract_strided_slice %23 {offsets = [1, 0], sizes = [1, 64], strides = [1, 1]} : vector<8x64xf32> to vector<1x64xf32>
      %46 = vector.extract_strided_slice %24 {offsets = [1, 0], sizes = [1, 64], strides = [1, 1]} : vector<8x64xf32> to vector<1x64xf32>
      %47 = vector.extract_strided_slice %25 {offsets = [1, 0], sizes = [1, 64], strides = [1, 1]} : vector<8x64xf32> to vector<1x64xf32>
      %48 = tpu.concatenate %40, %41, %42, %43, %44, %45, %46, %47 in 0 : vector<1x64xf32>, vector<1x64xf32>, vector<1x64xf32>, vector<1x64xf32>, vector<1x64xf32>, vector<1x64xf32>, vector<1x64xf32>, vector<1x64xf32> -> vector<8x64xf32>
      %c1 = arith.constant 1 : index
      %c0_21 = arith.constant 0 : index
      %c0_22 = arith.constant 0 : index
      %49 = vector.load %arg4[%c1, %c0_21, %c0_22] : memref<8x64x32xf32, #tpu.memory_space<vmem>>, vector<1x64x32xf32>
      %50 = vector.shape_cast %49 : vector<1x64x32xf32> to vector<64x32xf32>
      %cst_23 = arith.constant dense<0.000000e+00> : vector<8x32xf32>
      %51 = tpu.matmul %48, %50, %cst_23 {dimension_numbers = #tpu.dot_dimension_numbers<[1], [0], [0], [1], [0, 0, 1, 1], [], []>} : vector<8x64xf32>, vector<64x32xf32>, vector<8x32xf32> -> vector<8x32xf32>
      %52 = arith.addf %39, %51 : vector<8x32xf32>
      %53 = vector.extract_strided_slice %18 {offsets = [2, 0], sizes = [1, 64], strides = [1, 1]} : vector<8x64xf32> to vector<1x64xf32>
      %54 = vector.extract_strided_slice %19 {offsets = [2, 0], sizes = [1, 64], strides = [1, 1]} : vector<8x64xf32> to vector<1x64xf32>
      %55 = vector.extract_strided_slice %20 {offsets = [2, 0], sizes = [1, 64], strides = [1, 1]} : vector<8x64xf32> to vector<1x64xf32>
      %56 = vector.extract_strided_slice %21 {offsets = [2, 0], sizes = [1, 64], strides = [1, 1]} : vector<8x64xf32> to vector<1x64xf32>
      %57 = vector.extract_strided_slice %22 {offsets = [2, 0], sizes = [1, 64], strides = [1, 1]} : vector<8x64xf32> to vector<1x64xf32>
      %58 = vector.extract_strided_slice %23 {offsets = [2, 0], sizes = [1, 64], strides = [1, 1]} : vector<8x64xf32> to vector<1x64xf32>
      %59 = vector.extract_strided_slice %24 {offsets = [2, 0], sizes = [1, 64], strides = [1, 1]} : vector<8x64xf32> to vector<1x64xf32>
      %60 = vector.extract_strided_slice %25 {offsets = [2, 0], sizes = [1, 64], strides = [1, 1]} : vector<8x64xf32> to vector<1x64xf32>
      %61 = tpu.concatenate %53, %54, %55, %56, %57, %58, %59, %60 in 0 : vector<1x64xf32>, vector<1x64xf32>, vector<1x64xf32>, vector<1x64xf32>, vector<1x64xf32>, vector<1x64xf32>, vector<1x64xf32>, vector<1x64xf32> -> vector<8x64xf32>
      %c2 = arith.constant 2 : index
      %c0_24 = arith.constant 0 : index
      %c0_25 = arith.constant 0 : index
      %62 = vector.load %arg4[%c2, %c0_24, %c0_25] : memref<8x64x32xf32, #tpu.memory_space<vmem>>, vector<1x64x32xf32>
      %63 = vector.shape_cast %62 : vector<1x64x32xf32> to vector<64x32xf32>
      %cst_26 = arith.constant dense<0.000000e+00> : vector<8x32xf32>
      %64 = tpu.matmul %61, %63, %cst_26 {dimension_numbers = #tpu.dot_dimension_numbers<[1], [0], [0], [1], [0, 0, 1, 1], [], []>} : vector<8x64xf32>, vector<64x32xf32>, vector<8x32xf32> -> vector<8x32xf32>
      %65 = arith.addf %52, %64 : vector<8x32xf32>
      %66 = vector.extract_strided_slice %18 {offsets = [3, 0], sizes = [1, 64], strides = [1, 1]} : vector<8x64xf32> to vector<1x64xf32>
      %67 = vector.extract_strided_slice %19 {offsets = [3, 0], sizes = [1, 64], strides = [1, 1]} : vector<8x64xf32> to vector<1x64xf32>
      %68 = vector.extract_strided_slice %20 {offsets = [3, 0], sizes = [1, 64], strides = [1, 1]} : vector<8x64xf32> to vector<1x64xf32>
      %69 = vector.extract_strided_slice %21 {offsets = [3, 0], sizes = [1, 64], strides = [1, 1]} : vector<8x64xf32> to vector<1x64xf32>
      %70 = vector.extract_strided_slice %22 {offsets = [3, 0], sizes = [1, 64], strides = [1, 1]} : vector<8x64xf32> to vector<1x64xf32>
      %71 = vector.extract_strided_slice %23 {offsets = [3, 0], sizes = [1, 64], strides = [1, 1]} : vector<8x64xf32> to vector<1x64xf32>
      %72 = vector.extract_strided_slice %24 {offsets = [3, 0], sizes = [1, 64], strides = [1, 1]} : vector<8x64xf32> to vector<1x64xf32>
      %73 = vector.extract_strided_slice %25 {offsets = [3, 0], sizes = [1, 64], strides = [1, 1]} : vector<8x64xf32> to vector<1x64xf32>
      %74 = tpu.concatenate %66, %67, %68, %69, %70, %71, %72, %73 in 0 : vector<1x64xf32>, vector<1x64xf32>, vector<1x64xf32>, vector<1x64xf32>, vector<1x64xf32>, vector<1x64xf32>, vector<1x64xf32>, vector<1x64xf32> -> vector<8x64xf32>
      %c3 = arith.constant 3 : index
      %c0_27 = arith.constant 0 : index
      %c0_28 = arith.constant 0 : index
      %75 = vector.load %arg4[%c3, %c0_27, %c0_28] : memref<8x64x32xf32, #tpu.memory_space<vmem>>, vector<1x64x32xf32>
      %76 = vector.shape_cast %75 : vector<1x64x32xf32> to vector<64x32xf32>
      %cst_29 = arith.constant dense<0.000000e+00> : vector<8x32xf32>
      %77 = tpu.matmul %74, %76, %cst_29 {dimension_numbers = #tpu.dot_dimension_numbers<[1], [0], [0], [1], [0, 0, 1, 1], [], []>} : vector<8x64xf32>, vector<64x32xf32>, vector<8x32xf32> -> vector<8x32xf32>
      %78 = arith.addf %65, %77 : vector<8x32xf32>
      %79 = vector.extract_strided_slice %18 {offsets = [4, 0], sizes = [1, 64], strides = [1, 1]} : vector<8x64xf32> to vector<1x64xf32>
      %80 = vector.extract_strided_slice %19 {offsets = [4, 0], sizes = [1, 64], strides = [1, 1]} : vector<8x64xf32> to vector<1x64xf32>
      %81 = vector.extract_strided_slice %20 {offsets = [4, 0], sizes = [1, 64], strides = [1, 1]} : vector<8x64xf32> to vector<1x64xf32>
      %82 = vector.extract_strided_slice %21 {offsets = [4, 0], sizes = [1, 64], strides = [1, 1]} : vector<8x64xf32> to vector<1x64xf32>
      %83 = vector.extract_strided_slice %22 {offsets = [4, 0], sizes = [1, 64], strides = [1, 1]} : vector<8x64xf32> to vector<1x64xf32>
      %84 = vector.extract_strided_slice %23 {offsets = [4, 0], sizes = [1, 64], strides = [1, 1]} : vector<8x64xf32> to vector<1x64xf32>
      %85 = vector.extract_strided_slice %24 {offsets = [4, 0], sizes = [1, 64], strides = [1, 1]} : vector<8x64xf32> to vector<1x64xf32>
      %86 = vector.extract_strided_slice %25 {offsets = [4, 0], sizes = [1, 64], strides = [1, 1]} : vector<8x64xf32> to vector<1x64xf32>
      %87 = tpu.concatenate %79, %80, %81, %82, %83, %84, %85, %86 in 0 : vector<1x64xf32>, vector<1x64xf32>, vector<1x64xf32>, vector<1x64xf32>, vector<1x64xf32>, vector<1x64xf32>, vector<1x64xf32>, vector<1x64xf32> -> vector<8x64xf32>
      %c4 = arith.constant 4 : index
      %c0_30 = arith.constant 0 : index
      %c0_31 = arith.constant 0 : index
      %88 = vector.load %arg4[%c4, %c0_30, %c0_31] : memref<8x64x32xf32, #tpu.memory_space<vmem>>, vector<1x64x32xf32>
      %89 = vector.shape_cast %88 : vector<1x64x32xf32> to vector<64x32xf32>
      %cst_32 = arith.constant dense<0.000000e+00> : vector<8x32xf32>
      %90 = tpu.matmul %87, %89, %cst_32 {dimension_numbers = #tpu.dot_dimension_numbers<[1], [0], [0], [1], [0, 0, 1, 1], [], []>} : vector<8x64xf32>, vector<64x32xf32>, vector<8x32xf32> -> vector<8x32xf32>
      %91 = arith.addf %78, %90 : vector<8x32xf32>
      %92 = vector.extract_strided_slice %18 {offsets = [5, 0], sizes = [1, 64], strides = [1, 1]} : vector<8x64xf32> to vector<1x64xf32>
      %93 = vector.extract_strided_slice %19 {offsets = [5, 0], sizes = [1, 64], strides = [1, 1]} : vector<8x64xf32> to vector<1x64xf32>
      %94 = vector.extract_strided_slice %20 {offsets = [5, 0], sizes = [1, 64], strides = [1, 1]} : vector<8x64xf32> to vector<1x64xf32>
      %95 = vector.extract_strided_slice %21 {offsets = [5, 0], sizes = [1, 64], strides = [1, 1]} : vector<8x64xf32> to vector<1x64xf32>
      %96 = vector.extract_strided_slice %22 {offsets = [5, 0], sizes = [1, 64], strides = [1, 1]} : vector<8x64xf32> to vector<1x64xf32>
      %97 = vector.extract_strided_slice %23 {offsets = [5, 0], sizes = [1, 64], strides = [1, 1]} : vector<8x64xf32> to vector<1x64xf32>
      %98 = vector.extract_strided_slice %24 {offsets = [5, 0], sizes = [1, 64], strides = [1, 1]} : vector<8x64xf32> to vector<1x64xf32>
      %99 = vector.extract_strided_slice %25 {offsets = [5, 0], sizes = [1, 64], strides = [1, 1]} : vector<8x64xf32> to vector<1x64xf32>
      %100 = tpu.concatenate %92, %93, %94, %95, %96, %97, %98, %99 in 0 : vector<1x64xf32>, vector<1x64xf32>, vector<1x64xf32>, vector<1x64xf32>, vector<1x64xf32>, vector<1x64xf32>, vector<1x64xf32>, vector<1x64xf32> -> vector<8x64xf32>
      %c5 = arith.constant 5 : index
      %c0_33 = arith.constant 0 : index
      %c0_34 = arith.constant 0 : index
      %101 = vector.load %arg4[%c5, %c0_33, %c0_34] : memref<8x64x32xf32, #tpu.memory_space<vmem>>, vector<1x64x32xf32>
      %102 = vector.shape_cast %101 : vector<1x64x32xf32> to vector<64x32xf32>
      %cst_35 = arith.constant dense<0.000000e+00> : vector<8x32xf32>
      %103 = tpu.matmul %100, %102, %cst_35 {dimension_numbers = #tpu.dot_dimension_numbers<[1], [0], [0], [1], [0, 0, 1, 1], [], []>} : vector<8x64xf32>, vector<64x32xf32>, vector<8x32xf32> -> vector<8x32xf32>
      %104 = arith.addf %91, %103 : vector<8x32xf32>
      %105 = vector.extract_strided_slice %18 {offsets = [6, 0], sizes = [1, 64], strides = [1, 1]} : vector<8x64xf32> to vector<1x64xf32>
      %106 = vector.extract_strided_slice %19 {offsets = [6, 0], sizes = [1, 64], strides = [1, 1]} : vector<8x64xf32> to vector<1x64xf32>
      %107 = vector.extract_strided_slice %20 {offsets = [6, 0], sizes = [1, 64], strides = [1, 1]} : vector<8x64xf32> to vector<1x64xf32>
      %108 = vector.extract_strided_slice %21 {offsets = [6, 0], sizes = [1, 64], strides = [1, 1]} : vector<8x64xf32> to vector<1x64xf32>
      %109 = vector.extract_strided_slice %22 {offsets = [6, 0], sizes = [1, 64], strides = [1, 1]} : vector<8x64xf32> to vector<1x64xf32>
      %110 = vector.extract_strided_slice %23 {offsets = [6, 0], sizes = [1, 64], strides = [1, 1]} : vector<8x64xf32> to vector<1x64xf32>
      %111 = vector.extract_strided_slice %24 {offsets = [6, 0], sizes = [1, 64], strides = [1, 1]} : vector<8x64xf32> to vector<1x64xf32>
      %112 = vector.extract_strided_slice %25 {offsets = [6, 0], sizes = [1, 64], strides = [1, 1]} : vector<8x64xf32> to vector<1x64xf32>
      %113 = tpu.concatenate %105, %106, %107, %108, %109, %110, %111, %112 in 0 : vector<1x64xf32>, vector<1x64xf32>, vector<1x64xf32>, vector<1x64xf32>, vector<1x64xf32>, vector<1x64xf32>, vector<1x64xf32>, vector<1x64xf32> -> vector<8x64xf32>
      %c6 = arith.constant 6 : index
      %c0_36 = arith.constant 0 : index
      %c0_37 = arith.constant 0 : index
      %114 = vector.load %arg4[%c6, %c0_36, %c0_37] : memref<8x64x32xf32, #tpu.memory_space<vmem>>, vector<1x64x32xf32>
      %115 = vector.shape_cast %114 : vector<1x64x32xf32> to vector<64x32xf32>
      %cst_38 = arith.constant dense<0.000000e+00> : vector<8x32xf32>
      %116 = tpu.matmul %113, %115, %cst_38 {dimension_numbers = #tpu.dot_dimension_numbers<[1], [0], [0], [1], [0, 0, 1, 1], [], []>} : vector<8x64xf32>, vector<64x32xf32>, vector<8x32xf32> -> vector<8x32xf32>
      %117 = arith.addf %104, %116 : vector<8x32xf32>
      %118 = vector.extract_strided_slice %18 {offsets = [7, 0], sizes = [1, 64], strides = [1, 1]} : vector<8x64xf32> to vector<1x64xf32>
      %119 = vector.extract_strided_slice %19 {offsets = [7, 0], sizes = [1, 64], strides = [1, 1]} : vector<8x64xf32> to vector<1x64xf32>
      %120 = vector.extract_strided_slice %20 {offsets = [7, 0], sizes = [1, 64], strides = [1, 1]} : vector<8x64xf32> to vector<1x64xf32>
      %121 = vector.extract_strided_slice %21 {offsets = [7, 0], sizes = [1, 64], strides = [1, 1]} : vector<8x64xf32> to vector<1x64xf32>
      %122 = vector.extract_strided_slice %22 {offsets = [7, 0], sizes = [1, 64], strides = [1, 1]} : vector<8x64xf32> to vector<1x64xf32>
      %123 = vector.extract_strided_slice %23 {offsets = [7, 0], sizes = [1, 64], strides = [1, 1]} : vector<8x64xf32> to vector<1x64xf32>
      %124 = vector.extract_strided_slice %24 {offsets = [7, 0], sizes = [1, 64], strides = [1, 1]} : vector<8x64xf32> to vector<1x64xf32>
      %125 = vector.extract_strided_slice %25 {offsets = [7, 0], sizes = [1, 64], strides = [1, 1]} : vector<8x64xf32> to vector<1x64xf32>
      %126 = tpu.concatenate %118, %119, %120, %121, %122, %123, %124, %125 in 0 : vector<1x64xf32>, vector<1x64xf32>, vector<1x64xf32>, vector<1x64xf32>, vector<1x64xf32>, vector<1x64xf32>, vector<1x64xf32>, vector<1x64xf32> -> vector<8x64xf32>
      %c7 = arith.constant 7 : index
      %c0_39 = arith.constant 0 : index
      %c0_40 = arith.constant 0 : index
      %127 = vector.load %arg4[%c7, %c0_39, %c0_40] : memref<8x64x32xf32, #tpu.memory_space<vmem>>, vector<1x64x32xf32>
      %128 = vector.shape_cast %127 : vector<1x64x32xf32> to vector<64x32xf32>
      %cst_41 = arith.constant dense<0.000000e+00> : vector<8x32xf32>
      %129 = tpu.matmul %126, %128, %cst_41 {dimension_numbers = #tpu.dot_dimension_numbers<[1], [0], [0], [1], [0, 0, 1, 1], [], []>} : vector<8x64xf32>, vector<64x32xf32>, vector<8x32xf32> -> vector<8x32xf32>
      %130 = arith.addf %117, %129 : vector<8x32xf32>
      %c0_42 = arith.constant 0 : index
      %c0_43 = arith.constant 0 : index
      %131 = vector.load %arg5[%c0_42, %c0_43] : memref<1x32xf32, #tpu.memory_space<vmem>>, vector<1x32xf32>
      %132 = vector.broadcast %131 : vector<1x32xf32> to vector<8x32xf32>
      %133 = arith.addf %130, %132 : vector<8x32xf32>
      %c0_44 = arith.constant 0 : index
      %c0_45 = arith.constant 0 : index
      %134 = vector.load %arg6[%c0_44, %c0_45] : memref<32x128xf32, #tpu.memory_space<vmem>>, vector<32x128xf32>
      %cst_46 = arith.constant dense<0.000000e+00> : vector<8x128xf32>
      %135 = tpu.matmul %133, %134, %cst_46 {dimension_numbers = #tpu.dot_dimension_numbers<[1], [0], [0], [1], [0, 0, 1, 1], [], []>} : vector<8x32xf32>, vector<32x128xf32>, vector<8x128xf32> -> vector<8x128xf32>
      %c0_47 = arith.constant 0 : index
      %c0_48 = arith.constant 0 : index
      %136 = vector.load %arg8[%c0_47, %c0_48] : memref<1x128xf32, #tpu.memory_space<vmem>>, vector<1x128xf32>
      %137 = vector.broadcast %136 : vector<1x128xf32> to vector<8x128xf32>
      %138 = arith.addf %135, %137 : vector<8x128xf32>
      %cst_49 = arith.constant 0.000000e+00 : f32
      %139 = vector.broadcast %cst_49 : f32 to vector<2x32xf32>
      %cst_50 = arith.constant 0.000000e+00 : f32
      %140 = vector.broadcast %cst_50 : f32 to vector<2x32xf32>
      %141 = vector.extract_strided_slice %138 {offsets = [0, 0], sizes = [2, 128], strides = [1, 1]} : vector<8x128xf32> to vector<2x128xf32>
      %c0_51 = arith.constant 0 : index
      %c0_52 = arith.constant 0 : index
      %142 = vector.load %arg7[%c0_51, %c0_52] : memref<32x128xf32, #tpu.memory_space<vmem>>, vector<32x128xf32>
      %cst_53 = arith.constant dense<0.000000e+00> : vector<2x128xf32>
      %143 = tpu.matmul %139, %142, %cst_53 {dimension_numbers = #tpu.dot_dimension_numbers<[1], [0], [0], [1], [0, 0, 1, 1], [], []>} : vector<2x32xf32>, vector<32x128xf32>, vector<2x128xf32> -> vector<2x128xf32>
      %144 = arith.addf %141, %143 : vector<2x128xf32>
      %145 = vector.extract_strided_slice %144 {offsets = [0, 0], sizes = [2, 32], strides = [1, 1]} : vector<2x128xf32> to vector<2x32xf32>
      %146 = arith.negf %145 : vector<2x32xf32>
      %147 = math.exp %146 : vector<2x32xf32>
      %cst_54 = arith.constant 1.000000e+00 : f32
      %148 = vector.broadcast %cst_54 : f32 to vector<2x32xf32>
      %149 = arith.addf %148, %147 : vector<2x32xf32>
      %150 = arith.divf %148, %149 : vector<2x32xf32>
      %151 = vector.extract_strided_slice %144 {offsets = [0, 32], sizes = [2, 32], strides = [1, 1]} : vector<2x128xf32> to vector<2x32xf32>
      %152 = arith.negf %151 : vector<2x32xf32>
      %153 = math.exp %152 : vector<2x32xf32>
      %cst_55 = arith.constant 1.000000e+00 : f32
      %154 = vector.broadcast %cst_55 : f32 to vector<2x32xf32>
      %155 = arith.addf %154, %153 : vector<2x32xf32>
      %156 = arith.divf %154, %155 : vector<2x32xf32>
      %157 = vector.extract_strided_slice %144 {offsets = [0, 64], sizes = [2, 32], strides = [1, 1]} : vector<2x128xf32> to vector<2x32xf32>
      %158 = math.tanh %157 : vector<2x32xf32>
      %159 = vector.extract_strided_slice %144 {offsets = [0, 96], sizes = [2, 32], strides = [1, 1]} : vector<2x128xf32> to vector<2x32xf32>
      %160 = arith.negf %159 : vector<2x32xf32>
      %161 = math.exp %160 : vector<2x32xf32>
      %cst_56 = arith.constant 1.000000e+00 : f32
      %162 = vector.broadcast %cst_56 : f32 to vector<2x32xf32>
      %163 = arith.addf %162, %161 : vector<2x32xf32>
      %164 = arith.divf %162, %163 : vector<2x32xf32>
      %165 = arith.mulf %156, %140 : vector<2x32xf32>
      %166 = arith.mulf %150, %158 : vector<2x32xf32>
      %167 = arith.addf %165, %166 : vector<2x32xf32>
      %168 = math.tanh %167 : vector<2x32xf32>
      %169 = arith.mulf %164, %168 : vector<2x32xf32>
      %170 = vector.extract_strided_slice %138 {offsets = [2, 0], sizes = [2, 128], strides = [1, 1]} : vector<8x128xf32> to vector<2x128xf32>
      %c0_57 = arith.constant 0 : index
      %c0_58 = arith.constant 0 : index
      %171 = vector.load %arg7[%c0_57, %c0_58] : memref<32x128xf32, #tpu.memory_space<vmem>>, vector<32x128xf32>
      %cst_59 = arith.constant dense<0.000000e+00> : vector<2x128xf32>
      %172 = tpu.matmul %169, %171, %cst_59 {dimension_numbers = #tpu.dot_dimension_numbers<[1], [0], [0], [1], [0, 0, 1, 1], [], []>} : vector<2x32xf32>, vector<32x128xf32>, vector<2x128xf32> -> vector<2x128xf32>
      %173 = arith.addf %170, %172 : vector<2x128xf32>
      %174 = vector.extract_strided_slice %173 {offsets = [0, 0], sizes = [2, 32], strides = [1, 1]} : vector<2x128xf32> to vector<2x32xf32>
      %175 = arith.negf %174 : vector<2x32xf32>
      %176 = math.exp %175 : vector<2x32xf32>
      %cst_60 = arith.constant 1.000000e+00 : f32
      %177 = vector.broadcast %cst_60 : f32 to vector<2x32xf32>
      %178 = arith.addf %177, %176 : vector<2x32xf32>
      %179 = arith.divf %177, %178 : vector<2x32xf32>
      %180 = vector.extract_strided_slice %173 {offsets = [0, 32], sizes = [2, 32], strides = [1, 1]} : vector<2x128xf32> to vector<2x32xf32>
      %181 = arith.negf %180 : vector<2x32xf32>
      %182 = math.exp %181 : vector<2x32xf32>
      %cst_61 = arith.constant 1.000000e+00 : f32
      %183 = vector.broadcast %cst_61 : f32 to vector<2x32xf32>
      %184 = arith.addf %183, %182 : vector<2x32xf32>
      %185 = arith.divf %183, %184 : vector<2x32xf32>
      %186 = vector.extract_strided_slice %173 {offsets = [0, 64], sizes = [2, 32], strides = [1, 1]} : vector<2x128xf32> to vector<2x32xf32>
      %187 = math.tanh %186 : vector<2x32xf32>
      %188 = vector.extract_strided_slice %173 {offsets = [0, 96], sizes = [2, 32], strides = [1, 1]} : vector<2x128xf32> to vector<2x32xf32>
      %189 = arith.negf %188 : vector<2x32xf32>
      %190 = math.exp %189 : vector<2x32xf32>
      %cst_62 = arith.constant 1.000000e+00 : f32
      %191 = vector.broadcast %cst_62 : f32 to vector<2x32xf32>
      %192 = arith.addf %191, %190 : vector<2x32xf32>
      %193 = arith.divf %191, %192 : vector<2x32xf32>
      %194 = arith.mulf %185, %167 : vector<2x32xf32>
      %195 = arith.mulf %179, %187 : vector<2x32xf32>
      %196 = arith.addf %194, %195 : vector<2x32xf32>
      %197 = math.tanh %196 : vector<2x32xf32>
      %198 = arith.mulf %193, %197 : vector<2x32xf32>
      %199 = vector.extract_strided_slice %138 {offsets = [4, 0], sizes = [2, 128], strides = [1, 1]} : vector<8x128xf32> to vector<2x128xf32>
      %c0_63 = arith.constant 0 : index
      %c0_64 = arith.constant 0 : index
      %200 = vector.load %arg7[%c0_63, %c0_64] : memref<32x128xf32, #tpu.memory_space<vmem>>, vector<32x128xf32>
      %cst_65 = arith.constant dense<0.000000e+00> : vector<2x128xf32>
      %201 = tpu.matmul %198, %200, %cst_65 {dimension_numbers = #tpu.dot_dimension_numbers<[1], [0], [0], [1], [0, 0, 1, 1], [], []>} : vector<2x32xf32>, vector<32x128xf32>, vector<2x128xf32> -> vector<2x128xf32>
      %202 = arith.addf %199, %201 : vector<2x128xf32>
      %203 = vector.extract_strided_slice %202 {offsets = [0, 0], sizes = [2, 32], strides = [1, 1]} : vector<2x128xf32> to vector<2x32xf32>
      %204 = arith.negf %203 : vector<2x32xf32>
      %205 = math.exp %204 : vector<2x32xf32>
      %cst_66 = arith.constant 1.000000e+00 : f32
      %206 = vector.broadcast %cst_66 : f32 to vector<2x32xf32>
      %207 = arith.addf %206, %205 : vector<2x32xf32>
      %208 = arith.divf %206, %207 : vector<2x32xf32>
      %209 = vector.extract_strided_slice %202 {offsets = [0, 32], sizes = [2, 32], strides = [1, 1]} : vector<2x128xf32> to vector<2x32xf32>
      %210 = arith.negf %209 : vector<2x32xf32>
      %211 = math.exp %210 : vector<2x32xf32>
      %cst_67 = arith.constant 1.000000e+00 : f32
      %212 = vector.broadcast %cst_67 : f32 to vector<2x32xf32>
      %213 = arith.addf %212, %211 : vector<2x32xf32>
      %214 = arith.divf %212, %213 : vector<2x32xf32>
      %215 = vector.extract_strided_slice %202 {offsets = [0, 64], sizes = [2, 32], strides = [1, 1]} : vector<2x128xf32> to vector<2x32xf32>
      %216 = math.tanh %215 : vector<2x32xf32>
      %217 = vector.extract_strided_slice %202 {offsets = [0, 96], sizes = [2, 32], strides = [1, 1]} : vector<2x128xf32> to vector<2x32xf32>
      %218 = arith.negf %217 : vector<2x32xf32>
      %219 = math.exp %218 : vector<2x32xf32>
      %cst_68 = arith.constant 1.000000e+00 : f32
      %220 = vector.broadcast %cst_68 : f32 to vector<2x32xf32>
      %221 = arith.addf %220, %219 : vector<2x32xf32>
      %222 = arith.divf %220, %221 : vector<2x32xf32>
      %223 = arith.mulf %214, %196 : vector<2x32xf32>
      %224 = arith.mulf %208, %216 : vector<2x32xf32>
      %225 = arith.addf %223, %224 : vector<2x32xf32>
      %226 = math.tanh %225 : vector<2x32xf32>
      %227 = arith.mulf %222, %226 : vector<2x32xf32>
      %228 = vector.extract_strided_slice %138 {offsets = [6, 0], sizes = [2, 128], strides = [1, 1]} : vector<8x128xf32> to vector<2x128xf32>
      %c0_69 = arith.constant 0 : index
      %c0_70 = arith.constant 0 : index
      %229 = vector.load %arg7[%c0_69, %c0_70] : memref<32x128xf32, #tpu.memory_space<vmem>>, vector<32x128xf32>
      %cst_71 = arith.constant dense<0.000000e+00> : vector<2x128xf32>
      %230 = tpu.matmul %227, %229, %cst_71 {dimension_numbers = #tpu.dot_dimension_numbers<[1], [0], [0], [1], [0, 0, 1, 1], [], []>} : vector<2x32xf32>, vector<32x128xf32>, vector<2x128xf32> -> vector<2x128xf32>
      %231 = arith.addf %228, %230 : vector<2x128xf32>
      %232 = vector.extract_strided_slice %231 {offsets = [0, 0], sizes = [2, 32], strides = [1, 1]} : vector<2x128xf32> to vector<2x32xf32>
      %233 = arith.negf %232 : vector<2x32xf32>
      %234 = math.exp %233 : vector<2x32xf32>
      %cst_72 = arith.constant 1.000000e+00 : f32
      %235 = vector.broadcast %cst_72 : f32 to vector<2x32xf32>
      %236 = arith.addf %235, %234 : vector<2x32xf32>
      %237 = arith.divf %235, %236 : vector<2x32xf32>
      %238 = vector.extract_strided_slice %231 {offsets = [0, 32], sizes = [2, 32], strides = [1, 1]} : vector<2x128xf32> to vector<2x32xf32>
      %239 = arith.negf %238 : vector<2x32xf32>
      %240 = math.exp %239 : vector<2x32xf32>
      %cst_73 = arith.constant 1.000000e+00 : f32
      %241 = vector.broadcast %cst_73 : f32 to vector<2x32xf32>
      %242 = arith.addf %241, %240 : vector<2x32xf32>
      %243 = arith.divf %241, %242 : vector<2x32xf32>
      %244 = vector.extract_strided_slice %231 {offsets = [0, 64], sizes = [2, 32], strides = [1, 1]} : vector<2x128xf32> to vector<2x32xf32>
      %245 = math.tanh %244 : vector<2x32xf32>
      %246 = vector.extract_strided_slice %231 {offsets = [0, 96], sizes = [2, 32], strides = [1, 1]} : vector<2x128xf32> to vector<2x32xf32>
      %247 = arith.negf %246 : vector<2x32xf32>
      %248 = math.exp %247 : vector<2x32xf32>
      %cst_74 = arith.constant 1.000000e+00 : f32
      %249 = vector.broadcast %cst_74 : f32 to vector<2x32xf32>
      %250 = arith.addf %249, %248 : vector<2x32xf32>
      %251 = arith.divf %249, %250 : vector<2x32xf32>
      %252 = arith.mulf %243, %225 : vector<2x32xf32>
      %253 = arith.mulf %237, %245 : vector<2x32xf32>
      %254 = arith.addf %252, %253 : vector<2x32xf32>
      %255 = math.tanh %254 : vector<2x32xf32>
      %256 = arith.mulf %251, %255 : vector<2x32xf32>
      %c0_75 = arith.constant 0 : index
      %c0_76 = arith.constant 0 : index
      %257 = vector.load %arg12[%c0_75, %c0_76] : memref<2x32xf32, #tpu.memory_space<vmem>>, vector<2x32xf32>
      tpu.vector_store %arg12[%c0_75, %c0_76], %256 {strides = array<i32>} : memref<2x32xf32, #tpu.memory_space<vmem>>, vector<2x32xf32>,
    } else {
    }
    %c0 = arith.constant 0 : index
    %c0_1 = arith.constant 0 : index
    %3 = vector.load %arg12[%c0, %c0_1] : memref<2x32xf32, #tpu.memory_space<vmem>>, vector<2x32xf32>
    %c0_2 = arith.constant 0 : index
    %c0_3 = arith.constant 0 : index
    %4 = vector.load %arg9[%c0_2, %c0_3] : memref<32x1024xf32, #tpu.memory_space<vmem>>, vector<32x1024xf32>
    %cst = arith.constant dense<0.000000e+00> : vector<2x1024xf32>
    %5 = tpu.matmul %3, %4, %cst {dimension_numbers = #tpu.dot_dimension_numbers<[1], [0], [0], [1], [0, 0, 1, 1], [], []>} : vector<2x32xf32>, vector<32x1024xf32>, vector<2x1024xf32> -> vector<2x1024xf32>
    %c0_4 = arith.constant 0 : index
    %c0_5 = arith.constant 0 : index
    %6 = vector.load %arg10[%c0_4, %c0_5] : memref<1x1024xf32, #tpu.memory_space<vmem>>, vector<1x1024xf32>
    %7 = vector.broadcast %6 : vector<1x1024xf32> to vector<2x1024xf32>
    %8 = arith.addf %5, %7 : vector<2x1024xf32>
    %c0_6 = arith.constant 0 : index
    %c0_7 = arith.constant 0 : index
    %9 = vector.load %arg11[%c0_6, %c0_7] : memref<2x1024xf32, #tpu.memory_space<vmem>>, vector<2x1024xf32>
    tpu.vector_store %arg11[%c0_6, %c0_7], %8 {strides = array<i32>} : memref<2x1024xf32, #tpu.memory_space<vmem>>, vector<2x1024xf32>,
    return
  }
  func.func @transform_0(%arg0: i32) -> (i32, i32) {
    %c0_i32 = arith.constant 0 : i32
    %c0_i32_0 = arith.constant 0 : i32
    %c0_i32_1 = arith.constant 0 : i32
    return %c0_i32, %c0_i32_0 : i32, i32
  }
  func.func @transform_1(%arg0: i32) -> (i32, i32) {
    %c0_i32 = arith.constant 0 : i32
    %c0_i32_0 = arith.constant 0 : i32
    %c0_i32_1 = arith.constant 0 : i32
    return %c0_i32, %c0_i32_0 : i32, i32
  }
  func.func @transform_2(%arg0: i32) -> (i32, i32) {
    %c0_i32 = arith.constant 0 : i32
    %c0_i32_0 = arith.constant 0 : i32
    %c0_i32_1 = arith.constant 0 : i32
    return %c0_i32, %c0_i32_0 : i32, i32
  }
  func.func @transform_3(%arg0: i32) -> (i32, i32, i32) {
    %c0_i32 = arith.constant 0 : i32
    %c0_i32_0 = arith.constant 0 : i32
    %c0_i32_1 = arith.constant 0 : i32
    %c0_i32_2 = arith.constant 0 : i32
    return %c0_i32, %c0_i32_0, %c0_i32_1 : i32, i32, i32
  }
  func.func @transform_4(%arg0: i32) -> (i32, i32) {
    %c0_i32 = arith.constant 0 : i32
    %c0_i32_0 = arith.constant 0 : i32
    %c0_i32_1 = arith.constant 0 : i32
    return %c0_i32, %c0_i32_0 : i32, i32
  }
  func.func @transform_5(%arg0: i32) -> (i32, i32) {
    %c0_i32 = arith.constant 0 : i32
    %c0_i32_0 = arith.constant 0 : i32
    %c0_i32_1 = arith.constant 0 : i32
    return %c0_i32, %c0_i32_0 : i32, i32
  }
  func.func @transform_6(%arg0: i32) -> (i32, i32) {
    %c0_i32 = arith.constant 0 : i32
    %c0_i32_0 = arith.constant 0 : i32
    %c0_i32_1 = arith.constant 0 : i32
    return %c0_i32, %c0_i32_0 : i32, i32
  }
  func.func @transform_7(%arg0: i32) -> (i32, i32) {
    %c0_i32 = arith.constant 0 : i32
    %c0_i32_0 = arith.constant 0 : i32
    %c0_i32_1 = arith.constant 0 : i32
    return %c0_i32, %c0_i32_0 : i32, i32
  }
  func.func @transform_8(%arg0: i32) -> (i32, i32) {
    %c0_i32 = arith.constant 0 : i32
    %c0_i32_0 = arith.constant 0 : i32
    return %c0_i32, %arg0 : i32, i32
  }
  func.func @transform_9(%arg0: i32) -> (i32, i32) {
    %c0_i32 = arith.constant 0 : i32
    %c0_i32_0 = arith.constant 0 : i32
    return %c0_i32, %arg0 : i32, i32
  }
  func.func @transform_10(%arg0: i32) -> (i32, i32) {
    %c0_i32 = arith.constant 0 : i32
    %c0_i32_0 = arith.constant 0 : i32
    return %c0_i32, %arg0 : i32, i32
  }
}

</mosaic_0001>

<bundles_post_ra>
// kernel: tpu_custom_call.1
= control target key start
LH: loop header
LB: loop body
LE: loop exit
PB: predicated region body
PF: predicated region fallthrough
CT: control target
= control target key end

     0   :  { %v2681_v7 = vmov 0.0   ;;  %v2682_v13 = vmov 0   ;;  %vm71_vm0 = vcmask 1043456   ;;  %s3508_s0 = inlined_call_operand.vmem [shape: f32[36,512], index: 0, kind: input, shape index: {}]   ;;  %s3509_s1 = inlined_call_operand.vmem [shape: f32[8,36], index: 1, kind: input, shape index: {}]   ;;  %s3510_s2 = inlined_call_operand.vmem [shape: f32[8,1], index: 2, kind: input, shape index: {}]   ;;  %s3511_s3 = inlined_call_operand.vmem [shape: f32[8,64,32], index: 3, kind: input, shape index: {}]   ;;  %s3512_s4 = inlined_call_operand.vmem [shape: f32[1,32], index: 4, kind: input, shape index: {}]   ;;  %s3513_s5 = inlined_call_operand.vmem [shape: f32[32,128], index: 5, kind: input, shape index: {}]   ;;  %s3514_s6 = inlined_call_operand.vmem [shape: f32[32,128], index: 6, kind: input, shape index: {}]   ;;  %s3515_s7 = inlined_call_operand.vmem [shape: f32[1,128], index: 7, kind: input, shape index: {}]   ;;  %s3516_s8 = inlined_call_operand.vmem [shape: f32[32,1024], index: 8, kind: input, shape index: {}]   ;;  %s3517_s9 = inlined_call_operand.vmem [shape: f32[1,1024], index: 9, kind: input, shape index: {}]   ;;  %s3518_s10 = inlined_call_operand.hbm [shape: f32[2,1024], index: 10, kind: output, shape index: {}]  }
   0x1   :  { %v42_v0 = vld [vmem:[%s3508_s0 + $0x8] sm:$0xff]  ;;  %v44_v2 = vld [vmem:[%s3508_s0 + $0x18] sm:$0xff]  ;;  %v41_v5 = vld [vmem:[%s3508_s0] sm:$0xff]  ;;  %148 = vmatprep.mubr.f32.mxu0 %v2681_v7  ;;  %219 = vmatprep.mubr.f32.mxu1 %v2681_v7 }
   0x2   :  { %v46_v1 = vld [vmem:[%s3508_s0 + $0x28] sm:$0xff]  ;;  %v48_v4 = vld [vmem:[%s3508_s0 + $0x38] sm:$0xff]  ;;  %v45_v6 = vld [vmem:[%s3508_s0 + $0x20] sm:$0xff]  ;;  %2624 = vset.pattern.permute.xlu0 %v2682_v13 }
   0x3   :  { %v2442_v3 = vpack.c.bf16 %v46_v1, %v42_v0  ;;  %v2450_v8 = vpack.c.bf16 %v48_v4, %v44_v2  ;;  %v2444_v9 = vpack.c.bf16 %v45_v6, %v41_v5  ;;  %v43_v10 = vld [vmem:[%s3508_s0 + $0x10] sm:$0xff]  ;;  %v50_v12 = vld [vmem:[%s3508_s0 + $0x48] sm:$0xff]  ;;  %v52_v16 = vld [vmem:[%s3508_s0 + $0x58] sm:$0xff] }
   0x4   :  { %v47_v11 = vld [vmem:[%s3508_s0 + $0x30] sm:$0xff]  ;;  %v54_v15 = vld [vmem:[%s3508_s0 + $0x68] sm:$0xff]  ;;  %v56_v17 = vld [vmem:[%s3508_s0 + $0x78] sm:$0xff] }
   0x5   :  { %2443 = vmatprep.subr.bf16.mxu0 %v2442_v3  ;;  %v2452_v14 = vpack.c.bf16 %v47_v11, %v43_v10  ;;  %2451 = vmatprep.subr.bf16.mxu1 %v2450_v8  ;;  %v2446_v18 = vpack.c.bf16 %v54_v15, %v50_v12  ;;  %v2454_v19 = vpack.c.bf16 %v56_v17, %v52_v16  ;;  %v49_v20 = vld [vmem:[%s3508_s0 + $0x40] sm:$0xff]  ;;  %v51_v22 = vld [vmem:[%s3508_s0 + $0x50] sm:$0xff]  ;;  %v58_v26 = vld [vmem:[%s3508_s0 + $0x88] sm:$0xf] }
   0x6   :  { %2445 = vmatpush1.bf16.msra.mxu0 %v2444_v9  ;;  %v53_v21 = vld [vmem:[%s3508_s0 + $0x60] sm:$0xff]  ;;  %v55_v24 = vld [vmem:[%s3508_s0 + $0x70] sm:$0xff]  ;;  %v60_v27 = vld [vmem:[%s3508_s0 + $0x98] sm:$0xf] }
   0x7   :  { %2453 = vmatpush1.bf16.msra.mxu1 %v2452_v14  ;;  %v2448_v23 = vpack.c.bf16 %v53_v21, %v49_v20  ;;  %2447 = vmatprep.subr.bf16.mxu0 %v2446_v18  ;;  %v2456_v25 = vpack.c.bf16 %v55_v24, %v51_v22  ;;  %v61_v28 = vld [vmem:[%s3510_s2] sm:$0xff] }
   0x8   :  { %2455 = vmatprep.subr.bf16.mxu1 %v2454_v19 }
   0x9   :  { %15 = vsyncpa [#allocation4], 0  ;;  %64 = vperm.xlu0 %2624, %v61_v28   ;;  %v57_v29 = vld [vmem:[%s3508_s0 + $0x80] sm:$0xf]  ;;  %v59_v30 = vld [vmem:[%s3508_s0 + $0x90] sm:$0xf] }
   0xa   :  { %2449 = vmatpush1.bf16.msra.mxu0 %v2448_v23  ;;  %v40_v31 = vld [vmem:[%s3509_s1] sm:$0xff]  ;;  %vm67_vm1 = vcmask 293888   ;;  %v270_v33 = vld [vmem:[%s3511_s3 + $0x8] sm:$0xff]  ;;  %v2683_v35 = vmov 0.0|0.0   ;;  %v271_v39 = vld [vmem:[%s3511_s3 + $0x10] sm:$0xff]  ;;  %s2684_s20 = smov 64  }
   0xb   :  { %2457 = vmatpush1.bf16.msra.mxu1 %v2456_v25  ;;  %2054 = vmatprep.subr.msk.mxu0 %vm71_vm0, %v58_v26  ;;  %v269_v32 = vld [vmem:[%s3511_s3] sm:$0xff]  ;;  %v2061_v37 = vld [vmem:[%s3511_s3 + $0x48] sm:$0xff]  ;;  %v272_v40 = vld [vmem:[%s3511_s3 + $0x18] sm:$0xff]  ;;  %vm2685_vm2 = vmmov 0   ;;  %vm256_vm3 = vcmask 1040384   ;;  %vm260_vm4 = vcmask 1042432  }
   0xc   :  { %2057 = vmatprep.subr.msk.mxu1 %vm71_vm0, %v60_v27  ;;  %v2060_v34 = vld [vmem:[%s3511_s3 + $0x40] sm:$0xff]  ;;  %v2471_v36 = vpack.c.bf16 %v270_v33, %v269_v32  ;;  %v2062_v41 = vld [vmem:[%s3511_s3 + $0x50] sm:$0xff]  ;;  %v2474_v42 = vpack.c.bf16 %v272_v40, %v271_v39  ;;  %v2063_v43 = vld [vmem:[%s3511_s3 + $0x58] sm:$0xff]  ;;  %vm258_vm5 = vcmask 1041408   ;;  %vm263_vm6 = vcmask 1044480   ;;  %s2686_s26 = smov 32  }
   0xd   :  { %v2459_v38 = vpack.c.bf16 %v2061_v37, %v2060_v34  ;;  %v2462_v44 = vpack.c.bf16 %v2063_v43, %v2062_v41  ;;  %v273_v45 = vld [vmem:[%s3511_s3 + $0x20] sm:$0xff]  ;;  %v274_v46 = vld [vmem:[%s3511_s3 + $0x28] sm:$0xff]  ;;  %v275_v60 = vld [vmem:[%s3511_s3 + $0x30] sm:$0xff]  ;;  %vm265_vm7 = vcmask 1045504   ;;  %vm267_vm8 = vcmask 1046528  }
   0xe   :  { %2055 = vmatpush1.msk.msra.mxu0 %vm71_vm0, %v57_v29  ;;  %v2064_v47 = vld [vmem:[%s3511_s3 + $0x60] sm:$0xff]  ;;  %v2477_v49 = vpack.c.bf16 %v274_v46, %v273_v45  ;;  %v2065_v50 = vld [vmem:[%s3511_s3 + $0x68] sm:$0xff]  ;;  %v276_v61 = vld [vmem:[%s3511_s3 + $0x38] sm:$0xff]  ;;  %vm313_vm9 = vcmask 523264   ;;  %vm1129_vm10 = vcmask 261120   ;;  %vm1629_vm11 = vcmask 261126  }
   0xf   :  { %2058 = vmatpush1.msk.msra.mxu1 %vm71_vm0, %v59_v30  ;;  %2056 = vmatmul.mubr.msk.f32.vlgmr.msra.gmra.mrb[0].mxu0 %vm67_vm1, %v40_v31  ;;  %v2465_v51 = vpack.c.bf16 %v2065_v50, %v2064_v47  ;;  %v2480_v63 = vpack.c.bf16 %v276_v61, %v275_v60  ;;  %v2066_v5 = vld [vmem:[%s3511_s3 + $0x70] sm:$0xff]  ;;  %v2067_v6 = vld [vmem:[%s3511_s3 + $0x78] sm:$0xff]  ;;  %v2080_v45 = vld [vmem:[%s3511_s3 + $0xc8] sm:$0xff] }
  0x10   :  { %2059 = vmatmul.mubr.msk.f32.vlgmr.msra.gmra.mrb[0].mxu1 %vm67_vm1, %v40_v31  ;;  %2470 = vmatprep.subr.bf16.mxu1 %v2683_v35  ;;  %v2468_v10 = vpack.c.bf16 %v2067_v6, %v2066_v5  ;;  %v2070_v50 = vld [vmem:[%s3511_s3 + $0x80] sm:$0xff]  ;;  %v2082_v60 = vld [vmem:[%s3511_s3 + $0xd8] sm:$0xff]  ;;  %v2072_v6 = vld [vmem:[%s3511_s3 + $0x90] sm:$0xff] }
  0x11   :  { %2458 = vmatprep.subr.bf16.mxu0 %v2683_v35  ;;  %2472 = vmatpush3.bf16.msra.mxu1 %v2471_v36 }
  0x12   :  { %2460 = vmatpush3.bf16.msra.mxu0 %v2459_v38  ;;  %2473 = vmatprep.subr.bf16.mxu1 %v2683_v35 }
  0x13   :  { %2461 = vmatprep.subr.bf16.mxu0 %v2683_v35  ;;  %2270 = vmatprep.mubr.msk.f32.mxu1 %vm2685_vm2, %v2681_v7 }
  0x14   :  { %2251 = vmatprep.mubr.msk.f32.mxu0 %vm2685_vm2, %v2681_v7 }
  0x15   :  { %2475 = vmatpush3.bf16.msra.mxu1 %v2474_v42 }
  0x16   :  { %2463 = vmatpush3.bf16.msra.mxu0 %v2462_v44  ;;  %2476 = vmatprep.subr.bf16.mxu1 %v2683_v35  ;;  %v2079_v44 = vld [vmem:[%s3511_s3 + $0xc0] sm:$0xff] }
  0x17   :  { %2464 = vmatprep.subr.bf16.mxu0 %v2683_v35 }
  0x19   :  { %2478 = vmatpush3.bf16.msra.mxu1 %v2477_v49 }
  0x1a   :  { %2466 = vmatpush3.bf16.msra.mxu0 %v2465_v51  ;;  %2479 = vmatprep.subr.bf16.mxu1 %v2683_v35  ;;  %v2071_v51 = vld [vmem:[%s3511_s3 + $0x88] sm:$0xff] }
  0x1b   :  { %2467 = vmatprep.subr.bf16.mxu0 %v2683_v35 }
  0x1d   :  { %2481 = vmatpush3.bf16.msra.mxu1 %v2480_v63 }
  0x1e   :  { %2494 = vmatprep.subr.bf16.mxu1 %v2683_v35  ;;  %2469 = vmatpush3.bf16.msra.mxu0 %v2468_v10  ;;  %v2073_v10 = vld [vmem:[%s3511_s3 + $0x98] sm:$0xff] }
  0x1f   :  { %2482 = vmatprep.subr.bf16.mxu0 %v2683_v35 }
  0x88   :  { %v65_v48 = vpop.permute.xlu0 %64 }
  0xe2   :  { %v150_v52 = vpop.f32.mrb[0].mxu0 }
  0xe3   :  { %v151_v53 = vadd.f32 %v150_v52, %v65_v48  ;;  %v221_v54 = vpop.f32.mrb[0].mxu1  ;;  %v152_v55 = vpop.f32.mrb[1].mxu0 }
  0xe4   :  { %v222_v56 = vadd.f32 %v221_v54, %v65_v48  ;;  %v223_v57 = vpop.f32.mrb[1].mxu1  ;;  %v153_v59 = vadd.f32 %v152_v55, %v65_v48  ;;  %v2495_v54 = vpack.c.bf16 %v2080_v45, %v2079_v44  ;;  %v2086_v44 = vld [vmem:[%s3511_s3 + $0xf8] sm:$0xff] }
  0xe5   :  { %v2859_v58 = vmax.f32 %v151_v53, 0.0  ;;  %v224_v2 = vadd.f32 %v223_v57, %v65_v48 }
  0xe6   :  { %v2868_v62 = vmax.f32 %v222_v56, 0.0  ;;  %v2873_v1 = vmax.f32 %v153_v59, 0.0  ;;  %v2081_v59 = vld [vmem:[%s3511_s3 + $0xd0] sm:$0xff] }
  0xe7   :  { %279 = vrot.lane.b32.xlu0 %v2859_v58, %s2684_s20  ;;  %v231_v0 = vrot.slane %v2859_v58, 7  ;;  %v2890_v8 = vmax.f32 %v224_v2, 0.0  ;;  %v277_v15 = vrot.slane %v2859_v58, 1  ;;  %v460_v17 = vrot.slane %v2859_v58, 2 }
  0xe8   :  { %v245_v3 = vrot.slane %v2868_v62, 3  ;;  %v243_v4 = vrot.slane %v2868_v62, 4  ;;  %v238_v9 = vrot.slane %v2873_v1, 5  ;;  %v236_v11 = vrot.slane %v2873_v1, 6 }
  0xe9   :  { %232 = vrot.lane.b32.xlu1 %v231_v0, %s2684_s20  ;;  %v252_v12 = vrot.slane %v2890_v8, 1  ;;  %v250_v13 = vrot.slane %v2890_v8, 2  ;;  %v287_v14 = vrot.slane %v2868_v62, 5  ;;  %v282_v16 = vrot.slane %v2873_v1, 7 }
  0xea   :  { %v292_v18 = vrot.slane %v2890_v8, 3  ;;  %v473_v19 = vrot.slane %v2890_v8, 4  ;;  %v468_v20 = vrot.slane %v2868_v62, 6  ;;  %v578_v21 = vrot.slane %v2868_v62, 7 }
  0xeb   :  { %246 = vrot.lane.b32.xlu0 %v245_v3, %s2684_s20  ;;  %v568_v22 = vrot.slane %v2859_v58, 3  ;;  %v573_v23 = vrot.slane %v2873_v1, 1  ;;  %v678_v24 = vrot.slane %v2859_v58, 4  ;;  %v583_v25 = vrot.slane %v2890_v8, 5 }
  0xec   :  { %v683_v26 = vrot.slane %v2873_v1, 2  ;;  %v691_v27 = vrot.slane %v2890_v8, 6  ;;  %v796_v28 = vrot.slane %v2868_v62, 1  ;;  %v786_v29 = vrot.slane %v2859_v58, 5 }
  0xed   :  { %289 = vrot.lane.b32.xlu1 %v243_v4, %s2684_s20  ;;  %v791_v30 = vrot.slane %v2873_v1, 3  ;;  %v896_v31 = vrot.slane %v2859_v58, 6  ;;  %v801_v32 = vrot.slane %v2890_v8, 7  ;;  %v901_v33 = vrot.slane %v2873_v1, 4 }
  0xee   :  { %v906_v34 = vrot.slane %v2868_v62, 2  ;;  %v2483_v2 = vpack.c.bf16 %v2071_v51, %v2070_v50 }
  0xef   :  { %239 = vrot.lane.b32.xlu0 %v238_v9, %s2684_s20 }
  0xf1   :  { %284 = vrot.lane.b32.xlu1 %v236_v11, %s2684_s20 }
  0xf3   :  { %253 = vrot.lane.b32.xlu0 %v252_v12, %s2684_s20 }
  0xf5   :  { %294 = vrot.lane.b32.xlu1 %v250_v13, %s2684_s20 }
  0xf7   :  { %470 = vrot.lane.b32.xlu0 %v287_v14, %s2684_s20 }
  0xf9   :  { %462 = vrot.lane.b32.xlu1 %v277_v15, %s2684_s20 }
  0xfb   :  { %465 = vrot.lane.b32.xlu0 %v282_v16, %s2684_s20 }
  0xfd   :  { %570 = vrot.lane.b32.xlu1 %v460_v17, %s2684_s20 }
  0xff   :  { %475 = vrot.lane.b32.xlu0 %v292_v18, %s2684_s20 }
 0x101   :  { %575 = vrot.lane.b32.xlu1 %v2873_v1, %s2684_s20 }
 0x103   :  { %585 = vrot.lane.b32.xlu0 %v473_v19, %s2684_s20 }
 0x105   :  { %580 = vrot.lane.b32.xlu1 %v468_v20, %s2684_s20 }
 0x107   :  { %688 = vrot.lane.b32.xlu0 %v578_v21, %s2684_s20 }
 0x109   :  { %680 = vrot.lane.b32.xlu1 %v568_v22, %s2684_s20 }
 0x10b   :  { %685 = vrot.lane.b32.xlu0 %v573_v23, %s2684_s20 }
 0x10d   :  { %788 = vrot.lane.b32.xlu1 %v678_v24, %s2684_s20 }
 0x10f   :  { %693 = vrot.lane.b32.xlu0 %v583_v25, %s2684_s20 }
 0x111   :  { %793 = vrot.lane.b32.xlu1 %v683_v26, %s2684_s20 }
 0x113   :  { %803 = vrot.lane.b32.xlu0 %v691_v27, %s2684_s20 }
 0x115   :  { %798 = vrot.lane.b32.xlu1 %v2868_v62, %s2684_s20 }
 0x117   :  { %908 = vrot.lane.b32.xlu0 %v796_v28, %s2684_s20 }
 0x119   :  { %898 = vrot.lane.b32.xlu1 %v786_v29, %s2684_s20 }
 0x11b   :  { %903 = vrot.lane.b32.xlu0 %v791_v30, %s2684_s20 }
 0x11d   :  { %1005 = vrot.lane.b32.xlu1 %v896_v31, %s2684_s20 }
 0x11f   :  { %911 = vrot.lane.b32.xlu0 %v801_v32, %s2684_s20 }
 0x121   :  { %1009 = vrot.lane.b32.xlu1 %v901_v33, %s2684_s20 }
 0x123   :  { %1017 = vrot.lane.b32.xlu0 %v2890_v8, %s2684_s20 }
 0x125   :  { %1013 = vrot.lane.b32.xlu1 %v906_v34, %s2684_s20 }
 0x159   :  { %v280_v36 = vpop.permute.xlu0 %279 }
 0x15a   :  { %v297_v41 = vsel %vm256_vm3, %v277_v15, %v280_v36  ;;  %v2083_v15 = vld [vmem:[%s3511_s3 + $0xe0] sm:$0xff] }
 0x15b   :  { %v233_v37 = vpop.permute.xlu1 %232  ;;  %v298_v48 = vsel %vm258_vm5, %v297_v41, %v282_v16  ;;  %v2084_v16 = vld [vmem:[%s3511_s3 + $0xe8] sm:$0xff] }
 0x15c   :  { %v257_v39 = vsel %vm256_vm3, %v2859_v58, %v233_v37  ;;  %v2074_v37 = vld [vmem:[%s3511_s3 + $0xa0] sm:$0xff] }
 0x15d   :  { %v247_v38 = vpop.permute.xlu0 %246  ;;  %v259_v43 = vsel %vm258_vm5, %v257_v39, %v236_v11 }
 0x15f   :  { %v290_v40 = vpop.permute.xlu1 %289 }
 0x161   :  { %v240_v42 = vpop.permute.xlu0 %239 }
 0x162   :  { %v261_v46 = vsel %vm260_vm4, %v259_v43, %v240_v42  ;;  %v2085_v43 = vld [vmem:[%s3511_s3 + $0xf0] sm:$0xff] }
 0x163   :  { %v262_v47 = vsel %vm71_vm0, %v261_v46, %v243_v4  ;;  %v285_v49 = vpop.permute.xlu1 %284  ;;  %v2504_v51 = vpack.c.bf16 %v2086_v44, %v2085_v43 }
 0x164   :  { %v299_v52 = vsel %vm260_vm4, %v298_v48, %v285_v49  ;;  %v264_v53 = vsel %vm263_vm6, %v262_v47, %v247_v38  ;;  %v2075_v38 = vld [vmem:[%s3511_s3 + $0xa8] sm:$0xff]  ;;  %v2076_v48 = vld [vmem:[%s3511_s3 + $0xb0] sm:$0xff]  ;;  %v2077_v49 = vld [vmem:[%s3511_s3 + $0xb8] sm:$0xff] }
 0x165   :  { %v300_v55 = vsel %vm71_vm0, %v299_v52, %v287_v14  ;;  %v254_v56 = vpop.permute.xlu0 %253  ;;  %v266_v57 = vsel %vm265_vm7, %v264_v53, %v250_v13  ;;  %v2498_v13 = vpack.c.bf16 %v2082_v60, %v2081_v59  ;;  %v2492_v53 = vpack.c.bf16 %v2077_v49, %v2076_v48 }
 0x166   :  { %v268_v61 = vsel %vm267_vm8, %v266_v57, %v254_v56  ;;  %v301_v63 = vsel %vm263_vm6, %v300_v55, %v290_v40  ;;  %v2501_v40 = vpack.c.bf16 %v2084_v16, %v2083_v15  ;;  %v2089_v56 = vld [vmem:[%s3511_s3 + $0x108] sm:$0xff]  ;;  %v2100_v15 = vld [vmem:[%s3511_s3 + $0x158] sm:$0xff] }
 0x167   :  { %2271 = vmatmul.mubr.msk.f32.vlgmr.msra.gmra.mrb[2].mxu1 %vm313_vm9, %v268_v61  ;;  %v302_v4 = vsel %vm265_vm7, %v301_v63, %v292_v18  ;;  %v295_v5 = vpop.permute.xlu1 %294  ;;  %v2486_v18 = vpack.c.bf16 %v2073_v10, %v2072_v6  ;;  %v2098_v61 = vld [vmem:[%s3511_s3 + $0x148] sm:$0xff] }
 0x168   :  { %v303_v11 = vsel %vm267_vm8, %v302_v4, %v295_v5  ;;  %2496 = vmatpush3.bf16.msra.mxu1 %v2495_v54  ;;  %2308 = vmatprep.mubr.msk.f32.mxu1 %vm2685_vm2, %v2681_v7  ;;  %v2091_v5 = vld [vmem:[%s3511_s3 + $0x118] sm:$0xff] }
 0x169   :  { %v471_v14 = vpop.permute.xlu0 %470  ;;  %2252 = vmatmul.mubr.msk.f32.vlgmr.msra.gmra.mrb[2].mxu0 %vm313_vm9, %v303_v11  ;;  %2497 = vmatprep.subr.bf16.mxu1 %v2683_v35 }
 0x16a   :  { %2484 = vmatpush3.bf16.msra.mxu0 %v2483_v2  ;;  %2289 = vmatprep.mubr.msk.f32.mxu0 %vm2685_vm2, %v2681_v7 }
 0x16b   :  { %v463_v36 = vpop.permute.xlu1 %462  ;;  %2485 = vmatprep.subr.bf16.mxu0 %v2683_v35 }
 0x16c   :  { %v478_v39 = vsel %vm256_vm3, %v460_v17, %v463_v36  ;;  %2499 = vmatpush3.bf16.msra.mxu1 %v2498_v13  ;;  %v2489_v17 = vpack.c.bf16 %v2075_v38, %v2074_v37  ;;  %v2092_v36 = vld [vmem:[%s3511_s3 + $0x120] sm:$0xff]  ;;  %v2093_v37 = vld [vmem:[%s3511_s3 + $0x128] sm:$0xff] }
 0x16d   :  { %v466_v41 = vpop.permute.xlu0 %465  ;;  %v479_v42 = vsel %vm258_vm5, %v478_v39, %v2873_v1  ;;  %2500 = vmatprep.subr.bf16.mxu1 %v2683_v35  ;;  %v2513_v44 = vpack.c.bf16 %v2093_v37, %v2092_v36  ;;  %v2119_v37 = vld [vmem:[%s3511_s3 + $0x1e0] sm:$0xff] }
 0x16e   :  { %v480_v45 = vsel %vm260_vm4, %v479_v42, %v466_v41  ;;  %2487 = vmatpush3.bf16.msra.mxu0 %v2486_v18  ;;  %v2101_v42 = vld [vmem:[%s3511_s3 + $0x160] sm:$0xff] }
 0x16f   :  { %v481_v46 = vsel %vm71_vm0, %v480_v45, %v468_v20  ;;  %v571_v47 = vpop.permute.xlu1 %570  ;;  %2488 = vmatprep.subr.bf16.mxu0 %v2683_v35 }
 0x170   :  { %v588_v50 = vsel %vm256_vm3, %v568_v22, %v571_v47  ;;  %2502 = vmatpush3.bf16.msra.mxu1 %v2501_v40  ;;  %v482_v20 = vsel %vm263_vm6, %v481_v46, %v471_v14  ;;  %v2088_v22 = vld [vmem:[%s3511_s3 + $0x100] sm:$0xff]  ;;  %v2099_v14 = vld [vmem:[%s3511_s3 + $0x150] sm:$0xff]  ;;  %v2095_v46 = vld [vmem:[%s3511_s3 + $0x138] sm:$0xff] }
 0x171   :  { %v476_v52 = vpop.permute.xlu0 %475  ;;  %2503 = vmatprep.subr.bf16.mxu1 %v2683_v35  ;;  %v589_v54 = vsel %vm258_vm5, %v588_v50, %v573_v23  ;;  %v483_v59 = vsel %vm265_vm7, %v482_v20, %v473_v19  ;;  %v2097_v23 = vld [vmem:[%s3511_s3 + $0x140] sm:$0xff]  ;;  %v2507_v63 = vpack.c.bf16 %v2089_v56, %v2088_v22  ;;  %v2090_v19 = vld [vmem:[%s3511_s3 + $0x110] sm:$0xff]  ;;  %v2522_v39 = vpack.c.bf16 %v2100_v15, %v2099_v14  ;;  %v2111_v15 = vld [vmem:[%s3511_s3 + $0x1a8] sm:$0xff] }
 0x172   :  { %2490 = vmatpush3.bf16.msra.mxu0 %v2489_v17  ;;  %v484_v6 = vsel %vm267_vm8, %v483_v59, %v476_v52  ;;  %v2519_v11 = vpack.c.bf16 %v2098_v61, %v2097_v23  ;;  %v2510_v18 = vpack.c.bf16 %v2091_v5, %v2090_v19  ;;  %v2103_v50 = vld [vmem:[%s3511_s3 + $0x170] sm:$0xff]  ;;  %v2115_v59 = vld [vmem:[%s3511_s3 + $0x1c0] sm:$0xff] }
 0x173   :  { %v576_v55 = vpop.permute.xlu1 %575  ;;  %2491 = vmatprep.subr.bf16.mxu0 %v2683_v35  ;;  %v2110_v14 = vld [vmem:[%s3511_s3 + $0x1a0] sm:$0xff] }
 0x174   :  { %v590_v57 = vsel %vm260_vm4, %v589_v54, %v576_v55  ;;  %2505 = vmatpush3.bf16.msra.mxu1 %v2504_v51  ;;  %v2104_v51 = vld [vmem:[%s3511_s3 + $0x178] sm:$0xff]  ;;  %v2106_v54 = vld [vmem:[%s3511_s3 + $0x180] sm:$0xff]  ;;  %v2107_v55 = vld [vmem:[%s3511_s3 + $0x188] sm:$0xff] }
 0x175   :  { %v586_v60 = vpop.permute.xlu0 %585  ;;  %2518 = vmatprep.subr.bf16.mxu1 %v2683_v35  ;;  %v591_v2 = vsel %vm71_vm0, %v590_v57, %v578_v21  ;;  %v2528_v56 = vpack.c.bf16 %v2104_v51, %v2103_v50  ;;  %v2531_v23 = vpack.c.bf16 %v2107_v55, %v2106_v54  ;;  %v1120_v54 = vld [vmem:[%s3513_s5 + $0x10] sm:$0xff]  ;;  %v1121_v55 = vld [vmem:[%s3513_s5 + $0x18] sm:$0xff] }
 0x176   :  { %2493 = vmatpush3.bf16.msra.mxu0 %v2492_v53 }
 0x177   :  { %v581_v4 = vpop.permute.xlu1 %580  ;;  %2506 = vmatprep.subr.bf16.mxu0 %v2683_v35 }
 0x178   :  { %v592_v10 = vsel %vm263_vm6, %v591_v2, %v581_v4  ;;  %v2109_v2 = vld [vmem:[%s3511_s3 + $0x198] sm:$0xff] }
 0x179   :  { %v593_v21 = vsel %vm265_vm7, %v592_v10, %v583_v25  ;;  %2290 = vmatmul.mubr.msk.f32.vlgmr.msra.gmra.mrb[4].mxu0 %vm313_vm9, %v484_v6  ;;  %v689_v13 = vpop.permute.xlu0 %688  ;;  %v2117_v10 = vld [vmem:[%s3511_s3 + $0x1d0] sm:$0xff] }
 0x17a   :  { %2508 = vmatpush3.bf16.msra.mxu0 %v2507_v63  ;;  %v594_v16 = vsel %vm267_vm8, %v593_v21, %v586_v60  ;;  %2327 = vmatprep.mubr.msk.f32.mxu0 %vm2685_vm2, %v2681_v7  ;;  %v2116_v60 = vld [vmem:[%s3511_s3 + $0x1c8] sm:$0xff] }
 0x17b   :  { %2309 = vmatmul.mubr.msk.f32.vlgmr.msra.gmra.mrb[4].mxu1 %vm313_vm9, %v594_v16  ;;  %v681_v25 = vpop.permute.xlu1 %680  ;;  %2509 = vmatprep.subr.bf16.mxu0 %v2683_v35  ;;  %v2543_v5 = vpack.c.bf16 %v2116_v60, %v2115_v59 }
 0x17c   :  { %v696_v38 = vsel %vm256_vm3, %v678_v24, %v681_v25  ;;  %2520 = vmatpush3.bf16.msra.mxu1 %v2519_v11  ;;  %2346 = vmatprep.mubr.msk.f32.mxu1 %vm2685_vm2, %v2681_v7  ;;  %v2102_v24 = vld [vmem:[%s3511_s3 + $0x168] sm:$0xff]  ;;  %v2118_v11 = vld [vmem:[%s3511_s3 + $0x1d8] sm:$0xff] }
 0x17d   :  { %v686_v40 = vpop.permute.xlu0 %685  ;;  %v697_v41 = vsel %vm258_vm5, %v696_v38, %v683_v26  ;;  %2521 = vmatprep.subr.bf16.mxu1 %v2683_v35  ;;  %v2094_v26 = vld [vmem:[%s3511_s3 + $0x130] sm:$0xff]  ;;  %v2525_v48 = vpack.c.bf16 %v2102_v24, %v2101_v42  ;;  %v2113_v42 = vld [vmem:[%s3511_s3 + $0x1b8] sm:$0xff] }
 0x17e   :  { %v698_v43 = vsel %vm260_vm4, %v697_v41, %v686_v40  ;;  %2511 = vmatpush3.bf16.msra.mxu0 %v2510_v18  ;;  %v2516_v20 = vpack.c.bf16 %v2095_v46, %v2094_v26  ;;  %v2546_v18 = vpack.c.bf16 %v2118_v11, %v2117_v10 }
 0x17f   :  { %v699_v45 = vsel %vm71_vm0, %v698_v43, %v2868_v62  ;;  %v789_v17 = vpop.permute.xlu1 %788  ;;  %2512 = vmatprep.subr.bf16.mxu0 %v2683_v35 }
 0x180   :  { %v806_v47 = vsel %vm256_vm3, %v786_v29, %v789_v17  ;;  %2523 = vmatpush3.bf16.msra.mxu1 %v2522_v39  ;;  %v700_v52 = vsel %vm263_vm6, %v699_v45, %v689_v13  ;;  %v2537_v39 = vpack.c.bf16 %v2111_v15, %v2110_v14 }
 0x181   :  { %v694_v49 = vpop.permute.xlu0 %693  ;;  %2524 = vmatprep.subr.bf16.mxu1 %v2683_v35  ;;  %v807_v29 = vsel %vm258_vm5, %v806_v47, %v791_v30  ;;  %v701_v57 = vsel %vm265_vm7, %v700_v52, %v691_v27  ;;  %v2108_v27 = vld [vmem:[%s3511_s3 + $0x190] sm:$0xff] }
 0x182   :  { %2514 = vmatpush3.bf16.msra.mxu0 %v2513_v44  ;;  %v702_v4 = vsel %vm267_vm8, %v701_v57, %v694_v49  ;;  %v2534_v13 = vpack.c.bf16 %v2109_v2, %v2108_v27  ;;  %v2122_v44 = vld [vmem:[%s3511_s3 + $0x1f8] sm:$0xff] }
 0x183   :  { %v794_v53 = vpop.permute.xlu1 %793  ;;  %2515 = vmatprep.subr.bf16.mxu0 %v2683_v35  ;;  %v1206_v57 = vld [vmem:[%s3514_s6 + $0x18] sm:$0xff] }
 0x184   :  { %v808_v22 = vsel %vm260_vm4, %v807_v29, %v794_v53  ;;  %2526 = vmatpush3.bf16.msra.mxu1 %v2525_v48  ;;  %v1204_v29 = vld [vmem:[%s3514_s6 + $0x8] sm:$0xff] }
 0x185   :  { %v804_v30 = vpop.permute.xlu0 %803  ;;  %2527 = vmatprep.subr.bf16.mxu1 %v2683_v35  ;;  %v809_v61 = vsel %vm71_vm0, %v808_v22, %v796_v28  ;;  %v1205_v22 = vld [vmem:[%s3514_s6 + $0x10] sm:$0xff] }
 0x186   :  { %2517 = vmatpush3.bf16.msra.mxu0 %v2516_v20 }
 0x187   :  { %v799_v63 = vpop.permute.xlu1 %798  ;;  %2530 = vmatprep.subr.bf16.mxu0 %v2683_v35 }
 0x188   :  { %v810_v19 = vsel %vm263_vm6, %v809_v61, %v799_v63  ;;  %2529 = vmatpush3.bf16.msra.mxu1 %v2528_v56  ;;  %v2558_v56 = vpack.c.bf16 %v1121_v55, %v1120_v54 }
 0x189   :  { %v811_v28 = vsel %vm265_vm7, %v810_v19, %v801_v32  ;;  %2328 = vmatmul.mubr.msk.f32.vlgmr.msra.gmra.mrb[6].mxu0 %vm313_vm9, %v702_v4  ;;  %v909_v6 = vpop.permute.xlu0 %908  ;;  %2542 = vmatprep.subr.bf16.mxu1 %v2683_v35 }
 0x18a   :  { %2532 = vmatpush3.bf16.msra.mxu0 %v2531_v23  ;;  %v812_v21 = vsel %vm267_vm8, %v811_v28, %v804_v30  ;;  %2365 = vmatprep.mubr.msk.f32.mxu0 %vm2685_vm2, %v2681_v7  ;;  %v3335_v30 = vpack.c.bf16 %v1206_v57, %v1205_v22 }
 0x18b   :  { %2347 = vmatmul.mubr.msk.f32.vlgmr.msra.gmra.mrb[6].mxu1 %vm313_vm9, %v812_v21  ;;  %v899_v32 = vpop.permute.xlu1 %898  ;;  %2533 = vmatprep.subr.bf16.mxu0 %v2683_v35 }
 0x18c   :  { %v914_v16 = vsel %vm256_vm3, %v896_v31, %v899_v32  ;;  %2544 = vmatpush3.bf16.msra.mxu1 %v2543_v5  ;;  %2384 = vmatprep.mubr.msk.f32.mxu1 %vm2685_vm2, %v2681_v7  ;;  %v2120_v31 = vld [vmem:[%s3511_s3 + $0x1e8] sm:$0xff] }
 0x18d   :  { %v904_v25 = vpop.permute.xlu0 %903  ;;  %v915_v36 = vsel %vm258_vm5, %v914_v16, %v901_v33  ;;  %2545 = vmatprep.subr.bf16.mxu1 %v2683_v35  ;;  %v2112_v33 = vld [vmem:[%s3511_s3 + $0x1b0] sm:$0xff]  ;;  %v2549_v43 = vpack.c.bf16 %v2120_v31, %v2119_v37 }
 0x18e   :  { %v916_v38 = vsel %vm260_vm4, %v915_v36, %v904_v25  ;;  %2535 = vmatpush3.bf16.msra.mxu0 %v2534_v13  ;;  %v2540_v17 = vpack.c.bf16 %v2113_v42, %v2112_v33  ;;  %v2124_v25 = vld [vmem:[%s3512_s4] ss:$0 sm:$0xff] }
 0x18f   :  { %v917_v40 = vsel %vm71_vm0, %v916_v38, %v906_v34  ;;  %v1006_v41 = vpop.permute.xlu1 %1005  ;;  %2536 = vmatprep.subr.bf16.mxu0 %v2683_v35  ;;  %v2121_v34 = vld [vmem:[%s3511_s3 + $0x1f0] sm:$0xff] }
 0x190   :  { %v1020_v24 = vsel %vm256_vm3, %v231_v0, %v1006_v41  ;;  %2547 = vmatpush3.bf16.msra.mxu1 %v2546_v18  ;;  %v918_v45 = vsel %vm263_vm6, %v917_v40, %v909_v6  ;;  %v2552_v47 = vpack.c.bf16 %v2122_v44, %v2121_v34  ;;  %v2125_v40 = vld [vmem:[%s3515_s7] ss:$0 sm:$0xff] }
 0x191   :  { %2548 = vmatprep.subr.bf16.mxu1 %v2683_v35  ;;  %v912_v26 = vpop.permute.xlu0 %911  ;;  %v1021_v58 = vsel %vm258_vm5, %v1020_v24, %v238_v9  ;;  %v919_v48 = vsel %vm265_vm7, %v918_v45, %v2890_v8  ;;  %v1119_v8 = vld [vmem:[%s3513_s5 + $0x8] sm:$0xff] }
 0x192   :  { %2538 = vmatpush3.bf16.msra.mxu0 %v2537_v39  ;;  %v920_v9 = vsel %vm267_vm8, %v919_v48, %v912_v26 }
 0x193   :  { %v1010_v0 = vpop.permute.xlu1 %1009  ;;  %2539 = vmatprep.subr.bf16.mxu0 %v2683_v35 }
 0x194   :  { %v1022_v46 = vsel %vm260_vm4, %v1021_v58, %v1010_v0  ;;  %2550 = vmatpush3.bf16.msra.mxu1 %v2549_v43 }
 0x195   :  { %2551 = vmatprep.subr.bf16.mxu1 %v2683_v35  ;;  %v1023_v49 = vsel %vm71_vm0, %v1022_v46, %v245_v3  ;;  %v1018_v51 = vpop.permute.xlu0 %1017  ;;  %v1118_v3 = vld [vmem:[%s3513_s5] sm:$0xff] }
 0x196   :  { %2541 = vmatpush3.bf16.msra.mxu0 %v2540_v17  ;;  %v2555_v20 = vpack.c.bf16 %v1119_v8, %v1118_v3 }
 0x197   :  { %v1014_v1 = vpop.permute.xlu1 %1013  ;;  %2554 = vmatprep.subr.bf16.mxu0 %v2683_v35 }
 0x198   :  { %v1024_v50 = vsel %vm263_vm6, %v1023_v49, %v1014_v1  ;;  %2553 = vmatpush3.bf16.msra.mxu1 %v2552_v47 }
 0x199   :  { %v1025_v52 = vsel %vm265_vm7, %v1024_v50, %v252_v12  ;;  %2366 = vmatmul.mubr.msk.f32.vlgmr.msra.gmra.mrb[8].mxu0 %vm313_vm9, %v920_v9  ;;  %2560 = vmatprep.subr.bf16.mxu1 %v2683_v35  ;;  %v1203_v12 = vld [vmem:[%s3514_s6] sm:$0xff] }
 0x19a   :  { %v1026_v62 = vsel %vm267_vm8, %v1025_v52, %v1018_v51  ;;  %2395 = vmatprep.mubr.msk.f32.mxu0 %vm2685_vm2, %v2681_v7  ;;  %v3318_v53 = vpack.c.bf16 %v1204_v29, %v1203_v12  ;;  %2556 = vmatpush3.bf16.msra.mxu0 %v2555_v20 }
 0x19b   :  { %2385 = vmatmul.mubr.msk.f32.vlgmr.msra.gmra.mrb[8].mxu1 %vm313_vm9, %v1026_v62  ;;  %2557 = vmatprep.subr.bf16.mxu0 %v2683_v35 }
 0x19c   :  { %2406 = vmatprep.mubr.msk.f32.mxu1 %vm2685_vm2, %v2681_v7  ;;  %2562 = vmatpush3.bf16.msra.mxu1 %v3318_v53 }
 0x19d   :  { %2563 = vmatprep.subr.bf16.mxu1 %v2683_v35 }
 0x19e   :  { %2559 = vmatpush3.bf16.msra.mxu0 %v2558_v56 }
 0x19f   :  { %2566 = vmatprep.subr.bf16.mxu0 %v2683_v35 }
 0x1a0   :  { %2565 = vmatpush3.bf16.msra.mxu1 %v3335_v30 }
 0x1a1   :  { %2572 = vmatprep.subr.bf16.mxu1 %v2683_v35 }
 0x1a3   :  { %2407 = vmatmul.mubr.f32.vlgmr.msra.gmra.mrb[10].mxu1 %v2681_v7 }
 0x1a4   :  { %2574 = vmatpush3.bf16.msra.mxu1 %v3318_v53  ;;  %2428 = vmatprep.mubr.msk.f32.mxu1 %vm2685_vm2, %v2681_v7 }
 0x1a5   :  { %2575 = vmatprep.subr.bf16.mxu1 %v2683_v35 }
 0x1a8   :  { %2577 = vmatpush3.bf16.msra.mxu1 %v3335_v30 }
 0x23a   :  { %v456_v59 = vpop.f32.mrb[2].mxu1 }
 0x23b   :  { %v2272_v60 = vpop.f32.mrb[3].mxu1 }
 0x23c   :  { %v383_v23 = vpop.f32.mrb[2].mxu0 }
 0x23d   :  { %v457_v61 = vadd.f32 %v456_v59, %v383_v23  ;;  %v2253_v63 = vpop.f32.mrb[3].mxu0 }
 0x24c   :  { %v563_v27 = vpop.f32.mrb[4].mxu0 }
 0x24d   :  { %v567_v2 = vadd.f32 %v563_v27, %v457_v61  ;;  %v2291_v4 = vpop.f32.mrb[5].mxu0 }
 0x24e   :  { %v673_v19 = vpop.f32.mrb[4].mxu1 }
 0x24f   :  { %v677_v5 = vadd.f32 %v673_v19, %v567_v2  ;;  %v2310_v28 = vpop.f32.mrb[5].mxu1 }
 0x25c   :  { %v781_v6 = vpop.f32.mrb[6].mxu0 }
 0x25d   :  { %v785_v10 = vadd.f32 %v781_v6, %v677_v5  ;;  %v2329_v11 = vpop.f32.mrb[7].mxu0 }
 0x25e   :  { %v891_v21 = vpop.f32.mrb[6].mxu1 }
 0x25f   :  { %v895_v13 = vadd.f32 %v891_v21, %v785_v10  ;;  %v2348_v32 = vpop.f32.mrb[7].mxu1 }
 0x26c   :  { %v999_v14 = vpop.f32.mrb[8].mxu0 }
 0x26d   :  { %v1003_v15 = vadd.f32 %v999_v14, %v895_v13  ;;  %v2367_v16 = vpop.f32.mrb[9].mxu0 }
 0x26e   :  { %v1105_v18 = vpop.f32.mrb[8].mxu1 }
 0x26f   :  { %v1109_v36 = vadd.f32 %v1105_v18, %v1003_v15  ;;  %v2386_v37 = vpop.f32.mrb[9].mxu1 }
 0x271   :  { %v1117_v31 = vadd.f32 %v2124_v25, %v1109_v36 }
 0x273   :  { %2396 = vmatmul.mubr.msk.f32.vlgmr.msra.gmra.mrb[10].mxu0 %vm1129_vm10, %v1117_v31 }
 0x274   :  { %2568 = vmatpush3.bf16.msra.mxu0 %v3318_v53  ;;  %2417 = vmatprep.mubr.msk.f32.mxu0 %vm2685_vm2, %v2681_v7 }
 0x275   :  { %2569 = vmatprep.subr.bf16.mxu0 %v2683_v35 }
 0x276   :  { %v1276_v38 = vpop.f32.mrb[10].mxu1 }
 0x277   :  { %v2408_v39 = vpop.f32.mrb[11].mxu1 }
 0x278   :  { %2571 = vmatpush3.bf16.msra.mxu0 %v3335_v30 }
 0x279   :  { %2578 = vmatprep.subr.bf16.mxu0 %v2683_v35 }
 0x346   :  { %v1199_v41 = vpop.f32.mrb[10].mxu0 }
 0x347   :  { %v3359_v33 = vadd.f32 %v2125_v40, %v1199_v41  ;;  %v2397_v42 = vpop.f32.mrb[11].mxu0 }
 0x349   :  { %v1280_v24 = vadd.f32 %v1276_v38, %v3359_v33 }
 0x34b   :  { %2625 = vtanh.f32 %v1280_v24  ;;  %v2127_v34 = vmul.f32 -1.442695, %v1280_v24 }
 0x34d   :  { %2627 = vpow2.f32 %v2127_v34 }
 0x355   :  { %v2626_v43 = vpop.eup %2625 }
 0x356   :  { %1290 = vrot.lane.b32.xlu1 %v2626_v43, %s2684_s20 }
 0x357   :  { %v2628_v44 = vpop.eup %2627 }
 0x358   :  { %v1284_v45 = vadd.f32 1.0, %v2628_v44 }
 0x35a   :  { %2629 = vrcp.f32 %v1284_v45 }
 0x364   :  { %v2630_v17 = vpop.eup %2629 }
 0x365   :  { %v1288_v0 = vmul.f32 0.0, %v2630_v17 }
 0x3c8   :  { %v1291_v26 = vpop.permute.xlu1 %1290 }
 0x3c9   :  { %v1293_v58 = vmul.f32 %v2630_v17, %v1291_v26 }
 0x3cb   :  { %1295 = vrot.lane.b32.xlu0 %v1293_v58, %s2686_s26 }
 0x43d   :  { %v1296_v46 = vpop.permute.xlu0 %1295 }
 0x43e   :  { %v1298_v47 = vadd.f32 %v1296_v46, %v1288_v0  ;;  %v1641_v0 = vld [vmem:[%s3516_s8 + $0x48] sm:$0xff]  ;;  %v1635_v46 = vld [vmem:[%s3516_s8 + $0x18] sm:$0xff] }
 0x440   :  { %2631 = vtanh.f32 %v1298_v47 }
 0x44a   :  { %v2632_v48 = vpop.eup %2631 }
 0x44b   :  { %1301 = vrot.lane.b32.xlu1 %v2632_v48, %s2684_s20  ;;  %v1643_v48 = vld [vmem:[%s3516_s8 + $0x58] sm:$0xff] }
 0x4bd   :  { %v1302_v49 = vpop.permute.xlu1 %1301 }
 0x4be   :  { %v1304_v1 = vmul.f32 %v2630_v17, %v1302_v49  ;;  %v2592_v49 = vpack.c.bf16 %v1643_v48, %v1635_v46 }
 0x4c0   :  { %1306 = vrot.lane.b32.xlu0 %v1304_v1, %s2686_s26 }
 0x532   :  { %v1307_v9 = vpop.permute.xlu0 %1306 }
 0x533   :  { %2418 = vmatmul.mubr.msk.f32.vlgmr.msra.gmra.mrb[12].mxu0 %vm1129_vm10, %v1307_v9  ;;  %v1632_v9 = vld [vmem:[%s3516_s8] sm:$0xff] }
 0x534   :  { %2580 = vmatpush3.bf16.msra.mxu0 %v3318_v53  ;;  %2439 = vmatprep.mubr.msk.f32.mxu0 %vm2685_vm2, %v2681_v7 }
 0x535   :  { %2581 = vmatprep.subr.bf16.mxu0 %v2683_v35  ;;  %v1392_v35 = vrot.slane %v1298_v47, 6 }
 0x538   :  { %2583 = vmatpush3.bf16.msra.mxu0 %v3335_v30 }
 0x539   :  { %2593 = vmatprep.subr.bf16.mxu0 %v2592_v49 }
 0x606   :  { %v1376_v50 = vpop.f32.mrb[12].mxu0 }
 0x607   :  { %v1381_v51 = vrot.slane %v1376_v50, 6  ;;  %v2419_v52 = vpop.f32.mrb[13].mxu0  ;;  %v1640_v50 = vld [vmem:[%s3516_s8 + $0x40] sm:$0xff] }
 0x608   :  { %v2586_v52 = vpack.c.bf16 %v1640_v50, %v1632_v9 }
 0x609   :  { %v1383_v62 = vadd.f32 %v1381_v51, %v3359_v33  ;;  %v1634_v51 = vld [vmem:[%s3516_s8 + $0x10] sm:$0xff] }
 0x60b   :  { %2633 = vtanh.f32 %v1383_v62  ;;  %v2129_v8 = vmul.f32 -1.442695, %v1383_v62  ;;  %v1642_v62 = vld [vmem:[%s3516_s8 + $0x50] sm:$0xff] }
 0x60d   :  { %2635 = vpow2.f32 %v2129_v8  ;;  %v1657_v8 = vld [vmem:[%s3516_s8 + $0xc8] sm:$0xff] }
 0x615   :  { %v2634_v3 = vpop.eup %2633 }
 0x616   :  { %1396 = vrot.lane.b32.xlu1 %v2634_v3, %s2684_s20  ;;  %v1649_v3 = vld [vmem:[%s3516_s8 + $0x88] sm:$0xff] }
 0x617   :  { %v2636_v12 = vpop.eup %2635 }
 0x618   :  { %v1387_v20 = vadd.f32 1.0, %v2636_v12  ;;  %v2594_v12 = vpack.c.bf16 %v1642_v62, %v1634_v51 }
 0x61a   :  { %2637 = vrcp.f32 %v1387_v20  ;;  %v2588_v20 = vpack.c.bf16 %v1657_v8, %v1649_v3 }
 0x624   :  { %v2638_v29 = vpop.eup %2637 }
 0x625   :  { %v1394_v55 = vmul.f32 %v2638_v29, %v1392_v35 }
 0x688   :  { %v1397_v53 = vpop.permute.xlu1 %1396 }
 0x689   :  { %v1399_v54 = vmul.f32 %v2638_v29, %v1397_v53  ;;  %v1659_v53 = vld [vmem:[%s3516_s8 + $0xd8] sm:$0xff] }
 0x68b   :  { %1401 = vrot.lane.b32.xlu0 %v1399_v54, %s2686_s26  ;;  %v1648_v54 = vld [vmem:[%s3516_s8 + $0x80] sm:$0xff] }
 0x6fd   :  { %v1402_v22 = vpop.permute.xlu0 %1401 }
 0x6fe   :  { %v1404_v56 = vadd.f32 %v1402_v22, %v1394_v55  ;;  %v1656_v55 = vld [vmem:[%s3516_s8 + $0xc0] sm:$0xff]  ;;  %v1650_v22 = vld [vmem:[%s3516_s8 + $0x90] sm:$0xff] }
 0x700   :  { %2639 = vtanh.f32 %v1404_v56  ;;  %v1499_v21 = vrot.slane %v1404_v56, 6  ;;  %v1658_v56 = vld [vmem:[%s3516_s8 + $0xd0] sm:$0xff] }
 0x70a   :  { %v2640_v57 = vpop.eup %2639 }
 0x70b   :  { %1407 = vrot.lane.b32.xlu1 %v2640_v57, %s2684_s20  ;;  %v2590_v57 = vpack.c.bf16 %v1656_v55, %v1648_v54 }
 0x77d   :  { %v1408_v30 = vpop.permute.xlu1 %1407 }
 0x77e   :  { %v1410_v59 = vmul.f32 %v2638_v29, %v1408_v30  ;;  %v1651_v29 = vld [vmem:[%s3516_s8 + $0x98] sm:$0xff]  ;;  %v2598_v30 = vpack.c.bf16 %v1658_v56, %v1650_v22 }
 0x77f   :  { %v2596_v35 = vpack.c.bf16 %v1659_v53, %v1651_v29 }
 0x780   :  { %v1412_v60 = vrot.slane %v1410_v59, 2  ;;  %v1637_v59 = vld [vmem:[%s3516_s8 + $0x28] sm:$0xff] }
 0x782   :  { %1413 = vrot.lane.b32.xlu0 %v1412_v60, %s2686_s26  ;;  %v1645_v60 = vld [vmem:[%s3516_s8 + $0x68] sm:$0xff] }
 0x7f4   :  { %v1414_v23 = vpop.permute.xlu0 %1413 }
 0x7f5   :  { %2429 = vmatmul.mubr.msk.f32.vlgmr.msra.gmra.mrb[12].mxu1 %vm1129_vm10, %v1414_v23  ;;  %v1639_v23 = vld [vmem:[%s3516_s8 + $0x38] sm:$0xff] }
 0x7f6   :  { %1774 = vmatprep.mubr.f32.mxu1 %v2681_v7 }
 0x8c8   :  { %v1483_v61 = vpop.f32.mrb[12].mxu1 }
 0x8c9   :  { %v1488_v63 = vrot.slane %v1483_v61, 4  ;;  %v2430_v27 = vpop.f32.mrb[13].mxu1  ;;  %v2600_v61 = vpack.c.bf16 %v1645_v60, %v1637_v59 }
 0x8cb   :  { %v1490_v2 = vadd.f32 %v1488_v63, %v3359_v33  ;;  %v1647_v63 = vld [vmem:[%s3516_s8 + $0x78] sm:$0xff] }
 0x8cc   :  { %v2608_v27 = vpack.c.bf16 %v1647_v63, %v1639_v23 }
 0x8cd   :  { %2641 = vtanh.f32 %v1490_v2  ;;  %v2131_v19 = vmul.f32 -1.442695, %v1490_v2 }
 0x8cf   :  { %2643 = vpow2.f32 %v2131_v19 }
 0x8d7   :  { %v2642_v4 = vpop.eup %2641 }
 0x8d8   :  { %1503 = vrot.lane.b32.xlu1 %v2642_v4, %s2684_s20 }
 0x8d9   :  { %v2644_v5 = vpop.eup %2643 }
 0x8da   :  { %v1494_v28 = vadd.f32 1.0, %v2644_v5  ;;  %v1636_v5 = vld [vmem:[%s3516_s8 + $0x20] sm:$0xff] }
 0x8dc   :  { %2645 = vrcp.f32 %v1494_v28  ;;  %v1644_v28 = vld [vmem:[%s3516_s8 + $0x60] sm:$0xff] }
 0x8e6   :  { %v2646_v6 = vpop.eup %2645 }
 0x8e7   :  { %v1501_v13 = vmul.f32 %v2646_v6, %v1499_v21  ;;  %v1661_v21 = vld [vmem:[%s3516_s8 + $0xe8] sm:$0xff] }
 0x94a   :  { %v1504_v10 = vpop.permute.xlu1 %1503 }
 0x94b   :  { %v1506_v11 = vmul.f32 %v2646_v6, %v1504_v10  ;;  %v1646_v10 = vld [vmem:[%s3516_s8 + $0x70] sm:$0xff] }
 0x94d   :  { %1508 = vrot.lane.b32.xlu0 %v1506_v11, %s2686_s26  ;;  %v1653_v11 = vld [vmem:[%s3516_s8 + $0xa8] sm:$0xff] }
 0x9bf   :  { %v1509_v32 = vpop.permute.xlu0 %1508 }
 0x9c0   :  { %v1511_v14 = vadd.f32 %v1509_v32, %v1501_v13  ;;  %v1655_v13 = vld [vmem:[%s3516_s8 + $0xb8] sm:$0xff] }
 0x9c1   :  { %v1663_v32 = vld [vmem:[%s3516_s8 + $0xf8] sm:$0xff] }
 0x9c2   :  { %2647 = vtanh.f32 %v1511_v14  ;;  %v1606_v45 = vrot.slane %v1511_v14, 6  ;;  %v2602_v14 = vpack.c.bf16 %v1644_v28, %v1636_v5 }
 0x9cc   :  { %v2648_v15 = vpop.eup %2647 }
 0x9cd   :  { %1514 = vrot.lane.b32.xlu1 %v2648_v15, %s2684_s20 }
 0xa3f   :  { %v1515_v16 = vpop.permute.xlu1 %1514 }
 0xa40   :  { %v1517_v18 = vmul.f32 %v2646_v6, %v1515_v16  ;;  %v1638_v6 = vld [vmem:[%s3516_s8 + $0x30] sm:$0xff]  ;;  %v1652_v16 = vld [vmem:[%s3516_s8 + $0xa0] sm:$0xff] }
 0xa41   :  { %v2610_v15 = vpack.c.bf16 %v1646_v10, %v1638_v6 }
 0xa42   :  { %v1519_v25 = vrot.slane %v1517_v18, 4  ;;  %v2604_v18 = vpack.c.bf16 %v1661_v21, %v1653_v11 }
 0xa44   :  { %1520 = vrot.lane.b32.xlu0 %v1519_v25, %s2686_s26  ;;  %v2612_v25 = vpack.c.bf16 %v1663_v32, %v1655_v13 }
 0xab6   :  { %v1521_v36 = vpop.permute.xlu0 %1520 }
 0xab7   :  { %2440 = vmatmul.mubr.msk.f32.vlgmr.msra.gmra.mrb[14].mxu0 %vm1129_vm10, %v1521_v36  ;;  %v1660_v36 = vld [vmem:[%s3516_s8 + $0xe0] sm:$0xff] }
 0xab8   :  { %1845 = vmatprep.mubr.f32.mxu0 %v2681_v7  ;;  %2595 = vmatpush1.bf16.msra.mxu0 %v2594_v12 }
 0xab9   :  { %2597 = vmatprep.subr.bf16.mxu0 %v2596_v35 }
 0xabc   :  { %2599 = vmatpush1.bf16.msra.mxu0 %v2598_v30 }
 0xabd   :  { %2609 = vmatprep.subr.bf16.mxu0 %v2608_v27 }
 0xb8a   :  { %v1590_v37 = vpop.f32.mrb[14].mxu0 }
 0xb8b   :  { %v1595_v31 = vrot.slane %v1590_v37, 2  ;;  %v2441_v38 = vpop.f32.mrb[15].mxu0  ;;  %v1654_v37 = vld [vmem:[%s3516_s8 + $0xb0] sm:$0xff] }
 0xb8d   :  { %v1597_v39 = vadd.f32 %v1595_v31, %v3359_v33  ;;  %v1633_v33 = vld [vmem:[%s3516_s8 + $0x8] sm:$0xff]  ;;  %v1662_v31 = vld [vmem:[%s3516_s8 + $0xf0] sm:$0xff] }
 0xb8e   :  { %v2584_v47 = vpack.c.bf16 %v1641_v0, %v1633_v33 }
 0xb8f   :  { %2649 = vtanh.f32 %v1597_v39  ;;  %v2133_v41 = vmul.f32 -1.442695, %v1597_v39  ;;  %v2606_v39 = vpack.c.bf16 %v1660_v36, %v1652_v16 }
 0xb90   :  { %2585 = vmatprep.subr.bf16.mxu1 %v2584_v47 }
 0xb91   :  { %2651 = vpow2.f32 %v2133_v41  ;;  %2587 = vmatpush1.bf16.msra.mxu1 %v2586_v52  ;;  %v1666_v41 = vlaneseq }
 0xb92   :  { %2589 = vmatprep.subr.bf16.mxu1 %v2588_v20 }
 0xb95   :  { %2591 = vmatpush1.bf16.msra.mxu1 %v2590_v57 }
 0xb96   :  { %2601 = vmatprep.subr.bf16.mxu1 %v2600_v61 }
 0xb99   :  { %v2650_v40 = vpop.eup %2649 }
 0xb9a   :  { %1610 = vrot.lane.b32.xlu1 %v2650_v40, %s2684_s20  ;;  %v2614_v40 = vpack.c.bf16 %v1662_v31, %v1654_v37 }
 0xb9b   :  { %v2652_v42 = vpop.eup %2651 }
 0xb9c   :  { %v1601_v24 = vadd.f32 1.0, %v2652_v42  ;;  %v1667_v42 = vshrl.u32 %v1666_v41, 7 }
 0xb9e   :  { %2653 = vrcp.f32 %v1601_v24  ;;  %v1668_v24 = vsub.s32 0, %v1667_v42  ;;  %v1684_v49 = vsub.s32 4, %v1667_v42  ;;  %v1692_v62 = vsub.s32 6, %v1667_v42 }
 0xb9f   :  { %v1688_v12 = vsub.s32 5, %v1667_v42  ;;  %v1696_v20 = vsub.s32 7, %v1667_v42 }
 0xba8   :  { %v2654_v43 = vpop.eup %2653 }
 0xba9   :  { %v1608_v17 = vmul.f32 %v2654_v43, %v1606_v45  ;;  %v1664_v45 = vld [vmem:[%s3517_s9] sm:$0xff]  ;;  %s2688_s9 = smov [#allocation3]  }
 0xbaa   :  { %v1685_v54 = vrot.slane %v1664_v45, %v1684_v49  ;;  %v1693_v35 = vrot.slane %v1664_v45, %v1692_v62  ;;  %v1689_v56 = vrot.slane %v1664_v45, %v1688_v12  ;;  %v1697_v57 = vrot.slane %v1664_v45, %v1696_v20  ;;  %s2046_s15 = sshll.u32 %s2688_s9, 4  ;;  %s2047_s15 = int_to_ptr.vmem [resolvable:$true] %s2046_s15 }
 0xbab   :  { %s2657_s16 = scalar_lea.vmem %s2047_s15, 256  ;;  %p2662_p1 = scmp.lt.s32.totalorder %s2047_s15, %s2047_s15 }
 0xbac   :  { %p2658_p0 = scmp.ne.s32.totalorder %s2047_s15, %s2657_s16  ;;  %p2663_p2 = scmp.lt.s32.totalorder %s2657_s16, %s2657_s16 }
 0xbae   :  { %p2664_p3 = por %p2663_p2, %p2662_p1 }
 0xbb0   :  { %p2665_p4 = pnand %p2664_p3, %p2658_p0 }
 0xc0c   :  { %v1611_v34 = vpop.permute.xlu1 %1610 }
 0xc0d   :  { %v1613_v44 = vmul.f32 %v2654_v43, %v1611_v34  ;;  %v2687_v34 = vmov 1983009808  }
 0xc0f   :  { %1615 = vrot.lane.b32.xlu0 %v1613_v44, %s2686_s26  ;;  %v2005_v44 = vunpack.c.l.s4 %v2687_v34 }
 0xc11   :  { %v2006_v33 = vunpack.c.0.s8 %v2005_v44 }
 0xc13   :  { %v2009_v51 = vsub.s32 %v2006_v33, %v1667_v42 }
 0xc81   :  { %v1616_v26 = vpop.permute.xlu0 %1615 }
 0xc82   :  { %v1618_v58 = vadd.f32 %v1616_v26, %v1608_v17  ;;  %v1672_v17 = vsub.s32 1, %v1667_v42  ;;  %v1680_v26 = vsub.s32 3, %v1667_v42 }
 0xc84   :  { %2655 = vtanh.f32 %v1618_v58  ;;  %v1669_v58 = vrot.slane %v1664_v45, %v1668_v24  ;;  %v1673_v0 = vrot.slane %v1664_v45, %v1672_v17  ;;  %v1681_v46 = vrot.slane %v1664_v45, %v1680_v26 }
 0xc8e   :  { %v2656_v1 = vpop.eup %2655 }
 0xc8f   :  { %1621 = vrot.lane.b32.xlu1 %v2656_v1, %s2684_s20 }
 0xd01   :  { %v1622_v2 = vpop.permute.xlu1 %1621 }
 0xd02   :  { %v1624_v4 = vmul.f32 %v2654_v43, %v1622_v2  ;;  %v1676_v43 = vsub.s32 2, %v1667_v42 }
 0xd04   :  { %1626 = vrot.lane.b32.xlu0 %v1624_v4, %s2686_s26 }
 0xd76   :  { %v1627_v19 = vpop.permute.xlu0 %1626 }
 0xd77   :  { %1630 = vst.msk [vmem:[#allocation2 - $0x6] sm:$0xc0] %vm1629_vm11, %v1627_v19 }
 0xd7e   :  { %v1631_v38 = vld [vmem:[#allocation2] sm:$0x3] }
 0xd7f   :  { %2134 = vmatmul.mubr.msk.f32.vlgmr.msra.gmra.mrb[14].mxu1 %vm1129_vm10, %v1631_v38  ;;  %2135 = vmatmul.mubr.msk.f32.vlgmr.msra.gmra.mrb[16].mxu0 %vm1129_vm10, %v1631_v38 }
 0xd80   :  { %2603 = vmatpush1.bf16.msra.mxu1 %v2602_v14  ;;  %2611 = vmatpush1.bf16.msra.mxu0 %v2610_v15 }
 0xd81   :  { %2605 = vmatprep.subr.bf16.mxu1 %v2604_v18  ;;  %2613 = vmatprep.subr.bf16.mxu0 %v2612_v25 }
 0xd82   :  { %1916 = vmatprep.mubr.f32.mxu1 %v2681_v7  ;;  %1987 = vmatprep.mubr.f32.mxu0 %v2681_v7  ;;  %v1677_v7 = vrot.slane %v1664_v45, %v1676_v43 }
 0xd84   :  { %2607 = vmatpush1.bf16.msra.mxu1 %v2606_v39  ;;  %2615 = vmatpush1.bf16.msra.mxu0 %v2614_v40 }
 0xd87   :  { %2136 = vmatmul.mubr.msk.f32.vlgmr.msra.gmra.mrb[16].mxu1 %vm1129_vm10, %v1631_v38  ;;  %2137 = vmatmul.mubr.msk.f32.vlgmr.msra.gmra.mrb[18].mxu0 %vm1129_vm10, %v1631_v38 }
 0xe52   :  { %v1776_v47 = vpop.f32.mrb[14].mxu1  ;;  %v1847_v48 = vpop.f32.mrb[16].mxu0 }
 0xe53   :  { %v1777_v1 = vadd.f32 %v1776_v47, %v1669_v58  ;;  %v1848_v9 = vadd.f32 %v1847_v48, %v1677_v7  ;;  %v1778_v50 = vpop.f32.mrb[15].mxu1  ;;  %v1849_v52 = vpop.f32.mrb[17].mxu0 }
 0xe54   :  { %v1779_v3 = vadd.f32 %v1778_v50, %v1673_v0  ;;  %v1850_v8 = vadd.f32 %v1849_v52, %v1681_v46 }
 0xe56   :  { %v2002_v29 = vcombine.low %v1777_v1, %v1779_v3  ;;  %v2003_v53 = vcombine.low %v1848_v9, %v1850_v8 }
 0xe58   :  { %v2010_v55 = vrot.slane %v2002_v29, %v2009_v51  ;;  %v2017_v22 = vrot.slane %v2003_v53, %v2009_v51 }
 0xe5a   :  { %v1918_v30 = vpop.f32.mrb[16].mxu1  ;;  %v1989_v59 = vpop.f32.mrb[18].mxu0  ;;  %v2018_v60 = vcombine.low %v2010_v55, %v2017_v22 }
 0xe5b   :  { %v1919_v23 = vadd.f32 %v1918_v30, %v1685_v54  ;;  %v1990_v61 = vadd.f32 %v1989_v59, %v1693_v35  ;;  %v1920_v63 = vpop.f32.mrb[17].mxu1  ;;  %v1991_v27 = vpop.f32.mrb[19].mxu0 }
 0xe5c   :  { %v1921_v2 = vadd.f32 %v1920_v63, %v1689_v56  ;;  %v1992_v4 = vadd.f32 %v1991_v27, %v1697_v57  ;;  %2038 = vst [vmem:[#allocation3] sm:$0xff] %v2018_v60 }
 0xe5e   :  { %v2019_v19 = vcombine.low %v1919_v23, %v1921_v2  ;;  %v2020_v5 = vcombine.low %v1990_v61, %v1992_v4 }
 0xe60   :  { %v2027_v28 = vrot.slane %v2019_v19, %v2009_v51  ;;  %v2034_v6 = vrot.slane %v2020_v5, %v2009_v51 }
 0xe62   :  { %v2035_v10 = vcombine.low %v2027_v28, %v2034_v6 }
 0xe64   :  { %2039 = vst [vmem:[#allocation3 + $0x8] sm:$0xff] %v2035_v10 }
 0xe65   :  { %2668 = shalt.err (!%p2665_p4)
}
 0xe66   :  { %s2669_s18 = scalar_lea.hbm %s3518_s10, 256 }
 0xe67   :  { %p2670_p5 = scmp.ne.s32.totalorder %s3518_s10, %s2669_s18  ;;  %p2673_p6 = scmp.lt.u32.totalorder %s2669_s18, %s3518_s10 }
 0xe69   :  { %p2675_p7 = pnand %p2673_p6, %p2670_p5 }
 0xe6b   :  { %2678 = shalt.err (!%p2675_p7)
}
 0xe6c   :  { %2049 = dma.vmem_to_hbm [thread:$0]  %s2047_s15, 256, %s3518_s10, [#allocation4]  }
 0xe6d   :  { %2679 = dma.done.wait [#allocation4], 256  }
 0xe6e   :  { %2680 = vsyncadd [#allocation4], 4294967040 }
 0xe6f   :  { %2053 = vsyncpa [#allocation4], 1 }

</bundles_post_ra>
